<compile_context>
chip_gen: v6e
topology: v6e:2x2x1
jax: 0.10.0
libtpu: 0.0.40
codegen_flags: <defaults>
</compile_context>

<pallas_src>
import jax
import jax.numpy as jnp
from jax.experimental import pallas as pl
from jax.experimental.pallas import tpu as pltpu


def _round_up(x, m):
    return ((x + m - 1) // m) * m


# -----------------------------------------------------------------------------
# Pallas kernel: one (stream, batch-block) per grid step.
# -----------------------------------------------------------------------------
def dual_tcan_kernel(
    x_ref,                 # (1, TB, S, F)  f32   un-padded features
    w1_ref, b1_ref,        # (1, 3, F, H) bf16, (1, 1, H) f32   conv layer 1
    w2_ref, b2_ref,        # (1, 3, H, H) bf16, (1, 1, H) f32   conv layer 2
    wa1_ref, ba1_ref,      # (1, H, H)  bf16,   (1, 1, H) f32   attention linear 1
    wa2_ref,               # (1, 1, H)  f32     attention linear 2 (row)
    wfc_ref,               # (1, 1, H)  f32     final fc (row)
    sc_ref,                # (2, 2) f32 SMEM: [stream, (ba2, bfc)]
    out_ref,               # (1, 1, TB) f32     lane-major output block
):
    s = pl.program_id(0)                     # stream index: 0 = btc, 1 = gold
    _, TB, S, F = x_ref.shape
    H = w1_ref.shape[-1]
    R = TB * S

    # Sequence-boundary masks for the k=3, pad=1 conv — built ONCE, reused by
    # both conv layers (t = position of each row inside its own sequence).
    t = jax.lax.broadcasted_iota(jnp.int32, (R, 1), 0) % S
    prev_ok = t >= 1                         # row t-1 exists in the same sequence
    next_ok = t <= S - 2                     # row t+1 exists in the same sequence

    def conv_k3(h, w_ref_, b_ref_):
        # h: (R, C) f32.  Per-tap weights w_ref_[0, j]: (C, H) bf16.
        # Three accumulated K=C dots: no hk concatenation / materialization.
        h_prev = jnp.where(prev_ok, pltpu.roll(h, shift=1, axis=0), 0.0)
        h_next = jnp.where(next_ok, pltpu.roll(h, shift=R - 1, axis=0), 0.0)
        acc = jnp.dot(h_prev.astype(jnp.bfloat16), w_ref_[0, 0],
                      preferred_element_type=jnp.float32)
        acc = acc + jnp.dot(h.astype(jnp.bfloat16), w_ref_[0, 1],
                            preferred_element_type=jnp.float32)
        acc = acc + jnp.dot(h_next.astype(jnp.bfloat16), w_ref_[0, 2],
                            preferred_element_type=jnp.float32)
        return acc + b_ref_[0]

    x = x_ref[0].reshape(R, F)               # (R, F): batch*time rows, F lanes

    # Temporal conv stack (ReLU after each; dropout == identity at inference).
    h = jnp.maximum(conv_k3(x, w1_ref, b1_ref), 0.0)            # (R, H)
    g = jnp.maximum(conv_k3(h, w2_ref, b2_ref), 0.0)            # (R, H)

    # Temporal attention: Linear -> tanh -> Linear(H, 1) -> softmax over S.
    a = jnp.tanh(
        jnp.dot(g.astype(jnp.bfloat16), wa1_ref[0],
                preferred_element_type=jnp.float32) + ba1_ref[0])   # (R, H)
    a3 = a.reshape(TB, S, H)
    g3 = g.reshape(TB, S, H)

    # (H, 1) projections as broadcast-multiply + lane reduce (VPU/XLU), keeping
    # the MXU free of degenerate 1-lane outputs.
    scores = jnp.sum(a3 * wa2_ref[0], axis=-1) + sc_ref[s, 0]   # (TB, S)
    m = jnp.max(scores, axis=-1, keepdims=True)
    e = jnp.exp(scores - m)
    denom = jnp.sum(e, axis=-1, keepdims=True)
    attn = e * pl.reciprocal(denom, approx=True)                # softmax (EUP recip)

    attended = jnp.sum(g3 * attn[:, :, None], axis=1)           # (TB, H)
    fc = jnp.sum(attended * wfc_ref[0], axis=-1, keepdims=True) + sc_ref[s, 1]
    out_ref[...] = jax.nn.sigmoid(fc).reshape(1, 1, TB)         # lane-dense store


# -----------------------------------------------------------------------------
# Wrapper
# -----------------------------------------------------------------------------
def dual_tcan_forward(x, kp, feature_dim, *, batch_block_cap=128):
    """x: (B, S, 2*feature_dim).  kp: stacked kernel params (see to_kernel_params).

    Returns (btc_out, gold_out), each (B, 1) float32.
    """
    B, S, _ = x.shape
    F = feature_dim
    H = kp["w1"].shape[-1]

    TB = min(_round_up(B, 8), batch_block_cap)
    B_pad = _round_up(B, TB)
    nb = B_pad // TB

    feats = jnp.stack([x[:, :, :F], x[:, :, F:]], axis=0).astype(jnp.float32)
    feats = jnp.pad(feats, ((0, 0), (0, B_pad - B), (0, 0), (0, 0)))  # (2,B_pad,S,F)

    # Advisory cost estimate for XLA's scheduler.
    R = TB * S
    steps = 2 * nb
    flops = steps * 2 * R * H * (3 * F + 3 * H + H)
    transcendentals = steps * (R * H + TB * S + 2 * TB)
    weight_bytes = 2 * ((3 * F * H + 3 * H * H + H * H) * 2 + (5 * H + 2) * 4)
    bytes_accessed = int(feats.size * 4 + 2 * B_pad * 4 + nb * weight_bytes)

    in_specs = [
        pl.BlockSpec((1, TB, S, F), lambda s, b: (s, b, 0, 0)),
        pl.BlockSpec((1, 3, F, H), lambda s, b: (s, 0, 0, 0)),
        pl.BlockSpec((1, 1, H), lambda s, b: (s, 0, 0)),
        pl.BlockSpec((1, 3, H, H), lambda s, b: (s, 0, 0, 0)),
        pl.BlockSpec((1, 1, H), lambda s, b: (s, 0, 0)),
        pl.BlockSpec((1, H, H), lambda s, b: (s, 0, 0)),
        pl.BlockSpec((1, 1, H), lambda s, b: (s, 0, 0)),
        pl.BlockSpec((1, 1, H), lambda s, b: (s, 0, 0)),
        pl.BlockSpec((1, 1, H), lambda s, b: (s, 0, 0)),
        pl.BlockSpec(memory_space=pltpu.MemorySpace.SMEM),     # (2, 2) scalars
    ]
    out_specs = pl.BlockSpec((1, 1, TB), lambda s, b: (s, b, 0))

    out = pl.pallas_call(
        dual_tcan_kernel,
        grid=(2, nb),
        in_specs=in_specs,
        out_specs=out_specs,
        out_shape=jax.ShapeDtypeStruct((2, nb, TB), jnp.float32),
        compiler_params=pltpu.CompilerParams(
            dimension_semantics=("parallel", "parallel"),
            vmem_limit_bytes=32 * 1024 * 1024),
        cost_estimate=pl.CostEstimate(
            flops=int(flops),
            transcendentals=int(transcendentals),
            bytes_accessed=bytes_accessed),
    )(
        feats,
        kp["w1"], kp["b1"],
        kp["w2"], kp["b2"],
        kp["wa1"], kp["ba1"],
        kp["wa2"], kp["wfc"],
        kp["scalars"],
    )

    out = out.reshape(2, B_pad)[:, :B]
    return out[0].reshape(B, 1), out[1].reshape(B, 1)


# -----------------------------------------------------------------------------
# Deterministic parameter init (PyTorch layout) + conversion to kernel layout
# -----------------------------------------------------------------------------
def init_stream_params_pt(key, F, H):
    ks = jax.random.split(key, 10)
    s = 0.1
    return {
        "w1_pt": jax.random.normal(ks[0], (H, F, 3), jnp.float32) * s,  # Conv1d
        "b1":    jax.random.normal(ks[1], (H,), jnp.float32) * s,
        "w2_pt": jax.random.normal(ks[2], (H, H, 3), jnp.float32) * s,
        "b2":    jax.random.normal(ks[3], (H,), jnp.float32) * s,
        "wa1_pt": jax.random.normal(ks[4], (H, H), jnp.float32) * s,    # Linear
        "ba1":    jax.random.normal(ks[5], (H,), jnp.float32) * s,
        "wa2_pt": jax.random.normal(ks[6], (1, H), jnp.float32) * s,
        "ba2":    jax.random.normal(ks[7], (1,), jnp.float32) * s,
        "wfc_pt": jax.random.normal(ks[8], (1, H), jnp.float32) * s,
        "bfc":    jax.random.normal(ks[9], (1,), jnp.float32) * s,
    }


def to_kernel_params(stream_pts):
    """stream_pts: [btc_pt, gold_pt].  Returns stacked kernel params.

    Conv / attention matmul weights are stored as bf16 (MXU operands); biases,
    (H,1) projection rows and scalars stay f32.
    """
    def conv_taps(w_pt):
        # PyTorch Conv1d weight (Cout, Cin, 3) -> (3, Cin, Cout), taps [t-1, t, t+1]
        return jnp.stack([w_pt[:, :, j].T for j in range(3)], axis=0)

    def one(pt):
        return {
            "w1":  conv_taps(pt["w1_pt"]).astype(jnp.bfloat16),
            "b1":  pt["b1"].reshape(1, -1).astype(jnp.float32),
            "w2":  conv_taps(pt["w2_pt"]).astype(jnp.bfloat16),
            "b2":  pt["b2"].reshape(1, -1).astype(jnp.float32),
            "wa1": pt["wa1_pt"].T.astype(jnp.bfloat16),
            "ba1": pt["ba1"].reshape(1, -1).astype(jnp.float32),
            "wa2": pt["wa2_pt"].reshape(1, -1).astype(jnp.float32),
            "wfc": pt["wfc_pt"].reshape(1, -1).astype(jnp.float32),
            "scalars": jnp.concatenate([pt["ba2"], pt["bfc"]]).astype(jnp.float32),
        }

    streams = [one(pt) for pt in stream_pts]
    return {k: jnp.stack([st[k] for st in streams], axis=0) for k in streams[0]}


# -----------------------------------------------------------------------------
# Pure-JAX reference (mirrors the PyTorch forward exactly; dropout = identity)
# -----------------------------------------------------------------------------
def _conv1d_ref(x, w, b):
    # x: (B, Cin, S), w: (Cout, Cin, 3), b: (Cout,)
    B, Cin, S = x.shape
    xp = jnp.pad(x, ((0, 0), (0, 0), (1, 1)))
    out = jnp.zeros((B, w.shape[0], S), jnp.float32)
    for j in range(3):
        out = out + jnp.einsum("bcs,oc->bos", xp[:, :, j:j + S], w[:, :, j])
    return out + b[None, :, None]


def stream_forward_ref(feats, pt):
    x = jnp.transpose(feats, (0, 2, 1))                       # (B, F, S)
    x = jax.nn.relu(_conv1d_ref(x, pt["w1_pt"], pt["b1"]))
    x = jax.nn.relu(_conv1d_ref(x, pt["w2_pt"], pt["b2"]))
    x = jnp.transpose(x, (0, 2, 1))                           # (B, S, H)
    a = jnp.tanh(x @ pt["wa1_pt"].T + pt["ba1"])
    logits = a @ pt["wa2_pt"].T + pt["ba2"]                   # (B, S, 1)
    w = jax.nn.softmax(logits, axis=1)
    attended = jnp.sum(x * w, axis=1)                         # (B, H)
    return jax.nn.sigmoid(attended @ pt["wfc_pt"].T + pt["bfc"])


# -----------------------------------------------------------------------------
if __name__ == "__main__":
    B, S, F, H = 2, 8, 4, 32  # batch, sequence_length, feature_dim, hidden_dim

    key = jax.random.PRNGKey(0)
    kx, kb, kg = jax.random.split(key, 3)

    x = jax.random.normal(kx, (B, S, 2 * F), jnp.float32)

    btc_pt = init_stream_params_pt(kb, F, H)
    gold_pt = init_stream_params_pt(kg, F, H)
    kp = to_kernel_params([btc_pt, gold_pt])

    btc_out, gold_out = dual_tcan_forward(x, kp, F)
    btc_out = jax.block_until_ready(btc_out)
    gold_out = jax.block_until_ready(gold_out)

    # Correctness check against the pure-JAX f32 reference (tolerance relaxed
    # for the bf16 MXU operands; element-wise math stays f32).
    btc_ref = stream_forward_ref(x[:, :, :F], btc_pt)
    gold_ref = stream_forward_ref(x[:, :, F:], gold_pt)
    assert btc_out.shape == (B, 1) and gold_out.shape == (B, 1)
    assert float(jnp.max(jnp.abs(btc_out - btc_ref))) < 2e-2
    assert float(jnp.max(jnp.abs(gold_out - gold_ref))) < 2e-2

    # TODO(synk): nn.Dropout is treated as identity (inference semantics); the
    # stochastic training-mode mask is not reproduced.
    print("KERNEL_OK")
</pallas_src>

<mosaic_0001>
module attributes {stable_mosaic.version = 11 : i64} {
  func.func @dual_tcan_kernel(%arg0: i32, %arg1: i32, %arg2: memref<1x8x8x4xf32, #tpu.memory_space<vmem>>, %arg3: memref<1x3x4x32xbf16, #tpu.memory_space<vmem>>, %arg4: memref<1x1x32xf32, #tpu.memory_space<vmem>>, %arg5: memref<1x3x32x32xbf16, #tpu.memory_space<vmem>>, %arg6: memref<1x1x32xf32, #tpu.memory_space<vmem>>, %arg7: memref<1x32x32xbf16, #tpu.memory_space<vmem>>, %arg8: memref<1x1x32xf32, #tpu.memory_space<vmem>>, %arg9: memref<1x1x32xf32, #tpu.memory_space<vmem>>, %arg10: memref<1x1x32xf32, #tpu.memory_space<vmem>>, %arg11: memref<2x2xf32, #tpu.memory_space<smem>>, %arg12: memref<1x1x8xf32, #tpu.memory_space<vmem>>) attributes {dimension_semantics = [#tpu.dimension_semantics<parallel>, #tpu.dimension_semantics<parallel>], iteration_bounds = array<i64: 2, 1>, scalar_prefetch = 0 : i64, scratch_operands = 0 : i64, tpu.core_type = #tpu.core_type<tc>, window_params = [{transform_indices = @transform_0, window_bounds = array<i64: 1, 8, 8, 4>}, {transform_indices = @transform_1, window_bounds = array<i64: 1, 3, 4, 32>}, {transform_indices = @transform_2, window_bounds = array<i64: 1, 1, 32>}, {transform_indices = @transform_3, window_bounds = array<i64: 1, 3, 32, 32>}, {transform_indices = @transform_4, window_bounds = array<i64: 1, 1, 32>}, {transform_indices = @transform_5, window_bounds = array<i64: 1, 32, 32>}, {transform_indices = @transform_6, window_bounds = array<i64: 1, 1, 32>}, {transform_indices = @transform_7, window_bounds = array<i64: 1, 1, 32>}, {transform_indices = @transform_8, window_bounds = array<i64: 1, 1, 32>}, {transform_indices = @transform_9, window_bounds = array<i64: 2, 2>}, {transform_indices = @transform_10, window_bounds = array<i64: 1, 1, 8>}]} {
    %0 = tpu.iota {dimensions = array<i32: 0>} : vector<64x1xi32>
    %c8_i32 = arith.constant 8 : i32
    %c0_i32 = arith.constant 0 : i32
    %1 = arith.cmpi eq, %c8_i32, %c0_i32 : i32
    %c1_i32 = arith.constant 1 : i32
    %2 = arith.select %1, %c1_i32, %c8_i32 : i32
    %3 = vector.broadcast %2 : i32 to vector<64x1xi32>
    %4 = arith.remsi %0, %3 : vector<64x1xi32>
    %c0_i32_0 = arith.constant 0 : i32
    %5 = vector.broadcast %c0_i32_0 : i32 to vector<64x1xi32>
    %6 = arith.cmpi ne, %4, %5 : vector<64x1xi32>
    %c0_i32_1 = arith.constant 0 : i32
    %7 = vector.broadcast %c0_i32_1 : i32 to vector<64x1xi32>
    %8 = arith.cmpi slt, %4, %7 : vector<64x1xi32>
    %c0_i32_2 = arith.constant 0 : i32
    %9 = arith.cmpi slt, %2, %c0_i32_2 : i32
    %10 = vector.broadcast %9 : i1 to vector<64x1xi1>
    %11 = vector.broadcast %10 : vector<64x1xi1> to vector<64x1xi1>
    %12 = arith.xori %8, %11 : vector<64x1xi1>
    %13 = arith.andi %12, %6 : vector<64x1xi1>
    %14 = vector.broadcast %2 : i32 to vector<64x1xi32>
    %15 = arith.addi %4, %14 : vector<64x1xi32>
    %16 = arith.select %13, %15, %4 : vector<64x1xi1>, vector<64x1xi32>
    %c1_i32_3 = arith.constant 1 : i32
    %17 = vector.broadcast %c1_i32_3 : i32 to vector<64x1xi32>
    %18 = arith.cmpi sge, %16, %17 : vector<64x1xi32>
    %c6_i32 = arith.constant 6 : i32
    %19 = vector.broadcast %c6_i32 : i32 to vector<64x1xi32>
    %20 = arith.cmpi sle, %16, %19 : vector<64x1xi32>
    %c0 = arith.constant 0 : index
    %c0_4 = arith.constant 0 : index
    %c0_5 = arith.constant 0 : index
    %c0_6 = arith.constant 0 : index
    %21 = vector.load %arg2[%c0, %c0_4, %c0_5, %c0_6] : memref<1x8x8x4xf32, #tpu.memory_space<vmem>>, vector<1x8x8x4xf32>
    %22 = vector.shape_cast %21 : vector<1x8x8x4xf32> to vector<8x8x4xf32>
    %23 = vector.shape_cast %22 : vector<8x8x4xf32> to vector<64x4xf32>
    %c1_i32_7 = arith.constant 1 : i32
    %24 = tpu.dynamic_rotate %23 by %c1_i32_7 dim 0 : vector<64x4xf32>, i32 -> vector<64x4xf32>
    %cst = arith.constant 0.000000e+00 : f32
    %25 = vector.shape_cast %18 : vector<64x1xi1> to vector<64x1xi1>
    %26 = vector.broadcast %25 : vector<64x1xi1> to vector<64x4xi1>
    %27 = vector.broadcast %cst : f32 to vector<64x4xf32>
    %28 = arith.select %26, %24, %27 : vector<64x4xi1>, vector<64x4xf32>
    %c63_i32 = arith.constant 63 : i32
    %29 = tpu.dynamic_rotate %23 by %c63_i32 dim 0 : vector<64x4xf32>, i32 -> vector<64x4xf32>
    %cst_8 = arith.constant 0.000000e+00 : f32
    %30 = vector.shape_cast %20 : vector<64x1xi1> to vector<64x1xi1>
    %31 = vector.broadcast %30 : vector<64x1xi1> to vector<64x4xi1>
    %32 = vector.broadcast %cst_8 : f32 to vector<64x4xf32>
    %33 = arith.select %31, %29, %32 : vector<64x4xi1>, vector<64x4xf32>
    %34 = arith.truncf %28 : vector<64x4xf32> to vector<64x4xbf16>
    %c0_9 = arith.constant 0 : index
    %c0_10 = arith.constant 0 : index
    %c0_11 = arith.constant 0 : index
    %c0_12 = arith.constant 0 : index
    %35 = vector.load %arg3[%c0_9, %c0_10, %c0_11, %c0_12] : memref<1x3x4x32xbf16, #tpu.memory_space<vmem>>, vector<1x1x4x32xbf16>
    %36 = vector.shape_cast %35 : vector<1x1x4x32xbf16> to vector<4x32xbf16>
    %cst_13 = arith.constant dense<0.000000e+00> : vector<64x32xf32>
    %37 = tpu.matmul %34, %36, %cst_13 {dimension_numbers = #tpu.dot_dimension_numbers<[1], [0], [0], [1], [0, 0, 1, 1], [], []>} : vector<64x4xbf16>, vector<4x32xbf16>, vector<64x32xf32> -> vector<64x32xf32>
    %38 = arith.truncf %23 : vector<64x4xf32> to vector<64x4xbf16>
    %c0_14 = arith.constant 0 : index
    %c1 = arith.constant 1 : index
    %c0_15 = arith.constant 0 : index
    %c0_16 = arith.constant 0 : index
    %39 = vector.load %arg3[%c0_14, %c1, %c0_15, %c0_16] : memref<1x3x4x32xbf16, #tpu.memory_space<vmem>>, vector<1x1x4x32xbf16>
    %40 = vector.shape_cast %39 : vector<1x1x4x32xbf16> to vector<4x32xbf16>
    %cst_17 = arith.constant dense<0.000000e+00> : vector<64x32xf32>
    %41 = tpu.matmul %38, %40, %cst_17 {dimension_numbers = #tpu.dot_dimension_numbers<[1], [0], [0], [1], [0, 0, 1, 1], [], []>} : vector<64x4xbf16>, vector<4x32xbf16>, vector<64x32xf32> -> vector<64x32xf32>
    %42 = arith.addf %37, %41 : vector<64x32xf32>
    %43 = arith.truncf %33 : vector<64x4xf32> to vector<64x4xbf16>
    %c0_18 = arith.constant 0 : index
    %c2 = arith.constant 2 : index
    %c0_19 = arith.constant 0 : index
    %c0_20 = arith.constant 0 : index
    %44 = vector.load %arg3[%c0_18, %c2, %c0_19, %c0_20] : memref<1x3x4x32xbf16, #tpu.memory_space<vmem>>, vector<1x1x4x32xbf16>
    %45 = vector.shape_cast %44 : vector<1x1x4x32xbf16> to vector<4x32xbf16>
    %cst_21 = arith.constant dense<0.000000e+00> : vector<64x32xf32>
    %46 = tpu.matmul %43, %45, %cst_21 {dimension_numbers = #tpu.dot_dimension_numbers<[1], [0], [0], [1], [0, 0, 1, 1], [], []>} : vector<64x4xbf16>, vector<4x32xbf16>, vector<64x32xf32> -> vector<64x32xf32>
    %47 = arith.addf %42, %46 : vector<64x32xf32>
    %c0_22 = arith.constant 0 : index
    %c0_23 = arith.constant 0 : index
    %c0_24 = arith.constant 0 : index
    %48 = vector.load %arg4[%c0_22, %c0_23, %c0_24] : memref<1x1x32xf32, #tpu.memory_space<vmem>>, vector<1x1x32xf32>
    %49 = vector.shape_cast %48 : vector<1x1x32xf32> to vector<1x32xf32>
    %50 = vector.broadcast %49 : vector<1x32xf32> to vector<64x32xf32>
    %51 = arith.addf %47, %50 : vector<64x32xf32>
    %cst_25 = arith.constant 0.000000e+00 : f32
    %52 = vector.broadcast %cst_25 : f32 to vector<64x32xf32>
    %53 = arith.maximumf %51, %52 : vector<64x32xf32>
    %c1_i32_26 = arith.constant 1 : i32
    %54 = tpu.dynamic_rotate %53 by %c1_i32_26 dim 0 : vector<64x32xf32>, i32 -> vector<64x32xf32>
    %cst_27 = arith.constant 0.000000e+00 : f32
    %55 = vector.shape_cast %18 : vector<64x1xi1> to vector<64x1xi1>
    %56 = vector.broadcast %55 : vector<64x1xi1> to vector<64x32xi1>
    %57 = vector.broadcast %cst_27 : f32 to vector<64x32xf32>
    %58 = arith.select %56, %54, %57 : vector<64x32xi1>, vector<64x32xf32>
    %c63_i32_28 = arith.constant 63 : i32
    %59 = tpu.dynamic_rotate %53 by %c63_i32_28 dim 0 : vector<64x32xf32>, i32 -> vector<64x32xf32>
    %cst_29 = arith.constant 0.000000e+00 : f32
    %60 = vector.shape_cast %20 : vector<64x1xi1> to vector<64x1xi1>
    %61 = vector.broadcast %60 : vector<64x1xi1> to vector<64x32xi1>
    %62 = vector.broadcast %cst_29 : f32 to vector<64x32xf32>
    %63 = arith.select %61, %59, %62 : vector<64x32xi1>, vector<64x32xf32>
    %64 = arith.truncf %58 : vector<64x32xf32> to vector<64x32xbf16>
    %c0_30 = arith.constant 0 : index
    %c0_31 = arith.constant 0 : index
    %c0_32 = arith.constant 0 : index
    %c0_33 = arith.constant 0 : index
    %65 = vector.load %arg5[%c0_30, %c0_31, %c0_32, %c0_33] : memref<1x3x32x32xbf16, #tpu.memory_space<vmem>>, vector<1x1x32x32xbf16>
    %66 = vector.shape_cast %65 : vector<1x1x32x32xbf16> to vector<32x32xbf16>
    %cst_34 = arith.constant dense<0.000000e+00> : vector<64x32xf32>
    %67 = tpu.matmul %64, %66, %cst_34 {dimension_numbers = #tpu.dot_dimension_numbers<[1], [0], [0], [1], [0, 0, 1, 1], [], []>} : vector<64x32xbf16>, vector<32x32xbf16>, vector<64x32xf32> -> vector<64x32xf32>
    %68 = arith.truncf %53 : vector<64x32xf32> to vector<64x32xbf16>
    %c0_35 = arith.constant 0 : index
    %c1_36 = arith.constant 1 : index
    %c0_37 = arith.constant 0 : index
    %c0_38 = arith.constant 0 : index
    %69 = vector.load %arg5[%c0_35, %c1_36, %c0_37, %c0_38] : memref<1x3x32x32xbf16, #tpu.memory_space<vmem>>, vector<1x1x32x32xbf16>
    %70 = vector.shape_cast %69 : vector<1x1x32x32xbf16> to vector<32x32xbf16>
    %cst_39 = arith.constant dense<0.000000e+00> : vector<64x32xf32>
    %71 = tpu.matmul %68, %70, %cst_39 {dimension_numbers = #tpu.dot_dimension_numbers<[1], [0], [0], [1], [0, 0, 1, 1], [], []>} : vector<64x32xbf16>, vector<32x32xbf16>, vector<64x32xf32> -> vector<64x32xf32>
    %72 = arith.addf %67, %71 : vector<64x32xf32>
    %73 = arith.truncf %63 : vector<64x32xf32> to vector<64x32xbf16>
    %c0_40 = arith.constant 0 : index
    %c2_41 = arith.constant 2 : index
    %c0_42 = arith.constant 0 : index
    %c0_43 = arith.constant 0 : index
    %74 = vector.load %arg5[%c0_40, %c2_41, %c0_42, %c0_43] : memref<1x3x32x32xbf16, #tpu.memory_space<vmem>>, vector<1x1x32x32xbf16>
    %75 = vector.shape_cast %74 : vector<1x1x32x32xbf16> to vector<32x32xbf16>
    %cst_44 = arith.constant dense<0.000000e+00> : vector<64x32xf32>
    %76 = tpu.matmul %73, %75, %cst_44 {dimension_numbers = #tpu.dot_dimension_numbers<[1], [0], [0], [1], [0, 0, 1, 1], [], []>} : vector<64x32xbf16>, vector<32x32xbf16>, vector<64x32xf32> -> vector<64x32xf32>
    %77 = arith.addf %72, %76 : vector<64x32xf32>
    %c0_45 = arith.constant 0 : index
    %c0_46 = arith.constant 0 : index
    %c0_47 = arith.constant 0 : index
    %78 = vector.load %arg6[%c0_45, %c0_46, %c0_47] : memref<1x1x32xf32, #tpu.memory_space<vmem>>, vector<1x1x32xf32>
    %79 = vector.shape_cast %78 : vector<1x1x32xf32> to vector<1x32xf32>
    %80 = vector.broadcast %79 : vector<1x32xf32> to vector<64x32xf32>
    %81 = arith.addf %77, %80 : vector<64x32xf32>
    %cst_48 = arith.constant 0.000000e+00 : f32
    %82 = vector.broadcast %cst_48 : f32 to vector<64x32xf32>
    %83 = arith.maximumf %81, %82 : vector<64x32xf32>
    %84 = arith.truncf %83 : vector<64x32xf32> to vector<64x32xbf16>
    %c0_49 = arith.constant 0 : index
    %c0_50 = arith.constant 0 : index
    %c0_51 = arith.constant 0 : index
    %85 = vector.load %arg7[%c0_49, %c0_50, %c0_51] : memref<1x32x32xbf16, #tpu.memory_space<vmem>>, vector<1x32x32xbf16>
    %86 = vector.shape_cast %85 : vector<1x32x32xbf16> to vector<32x32xbf16>
    %cst_52 = arith.constant dense<0.000000e+00> : vector<64x32xf32>
    %87 = tpu.matmul %84, %86, %cst_52 {dimension_numbers = #tpu.dot_dimension_numbers<[1], [0], [0], [1], [0, 0, 1, 1], [], []>} : vector<64x32xbf16>, vector<32x32xbf16>, vector<64x32xf32> -> vector<64x32xf32>
    %c0_53 = arith.constant 0 : index
    %c0_54 = arith.constant 0 : index
    %c0_55 = arith.constant 0 : index
    %88 = vector.load %arg8[%c0_53, %c0_54, %c0_55] : memref<1x1x32xf32, #tpu.memory_space<vmem>>, vector<1x1x32xf32>
    %89 = vector.shape_cast %88 : vector<1x1x32xf32> to vector<1x32xf32>
    %90 = vector.broadcast %89 : vector<1x32xf32> to vector<64x32xf32>
    %91 = arith.addf %87, %90 : vector<64x32xf32>
    %92 = math.tanh %91 : vector<64x32xf32>
    %93 = vector.shape_cast %92 : vector<64x32xf32> to vector<8x8x32xf32>
    %94 = vector.shape_cast %83 : vector<64x32xf32> to vector<8x8x32xf32>
    %c0_56 = arith.constant 0 : index
    %c0_57 = arith.constant 0 : index
    %c0_58 = arith.constant 0 : index
    %95 = vector.load %arg9[%c0_56, %c0_57, %c0_58] : memref<1x1x32xf32, #tpu.memory_space<vmem>>, vector<1x1x32xf32>
    %96 = vector.shape_cast %95 : vector<1x1x32xf32> to vector<1x32xf32>
    %97 = vector.shape_cast %96 : vector<1x32xf32> to vector<1x1x32xf32>
    %98 = vector.broadcast %97 : vector<1x1x32xf32> to vector<8x8x32xf32>
    %99 = arith.mulf %93, %98 : vector<8x8x32xf32>
    %cst_59 = arith.constant dense<0.000000e+00> : vector<8x8xf32>
    %100 = vector.multi_reduction <add>, %99, %cst_59 [2] : vector<8x8x32xf32> to vector<8x8xf32>
    %101 = arith.index_cast %arg0 : i32 to index
    %c0_60 = arith.constant 0 : index
    %102 = memref.load %arg11[%101, %c0_60] : memref<2x2xf32, #tpu.memory_space<smem>>
    %103 = vector.broadcast %102 : f32 to vector<8x8xf32>
    %104 = arith.addf %100, %103 : vector<8x8xf32>
    %cst_61 = arith.constant dense<0xFF800000> : vector<8xf32>
    %105 = vector.multi_reduction <maximumf>, %104, %cst_61 [1] : vector<8x8xf32> to vector<8xf32>
    %106 = vector.shape_cast %105 : vector<8xf32> to vector<8x1xf32>
    %107 = vector.broadcast %106 : vector<8x1xf32> to vector<8x8xf32>
    %108 = arith.subf %104, %107 : vector<8x8xf32>
    %109 = math.exp %108 : vector<8x8xf32>
    %cst_62 = arith.constant dense<0.000000e+00> : vector<8xf32>
    %110 = vector.multi_reduction <add>, %109, %cst_62 [1] : vector<8x8xf32> to vector<8xf32>
    %111 = vector.shape_cast %110 : vector<8xf32> to vector<8x1xf32>
    %112 = tpu.reciprocal %111 {approx = true} : vector<8x1xf32> -> vector<8x1xf32>
    %113 = vector.broadcast %112 : vector<8x1xf32> to vector<8x8xf32>
    %114 = arith.mulf %109, %113 : vector<8x8xf32>
    %115 = vector.shape_cast %114 : vector<8x8xf32> to vector<8x8x1xf32>
    %116 = vector.broadcast %115 : vector<8x8x1xf32> to vector<8x8x32xf32>
    %117 = arith.mulf %94, %116 : vector<8x8x32xf32>
    %cst_63 = arith.constant dense<0.000000e+00> : vector<8x32xf32>
    %118 = vector.multi_reduction <add>, %117, %cst_63 [1] : vector<8x8x32xf32> to vector<8x32xf32>
    %c0_64 = arith.constant 0 : index
    %c0_65 = arith.constant 0 : index
    %c0_66 = arith.constant 0 : index
    %119 = vector.load %arg10[%c0_64, %c0_65, %c0_66] : memref<1x1x32xf32, #tpu.memory_space<vmem>>, vector<1x1x32xf32>
    %120 = vector.shape_cast %119 : vector<1x1x32xf32> to vector<1x32xf32>
    %121 = vector.broadcast %120 : vector<1x32xf32> to vector<8x32xf32>
    %122 = arith.mulf %118, %121 : vector<8x32xf32>
    %cst_67 = arith.constant dense<0.000000e+00> : vector<8xf32>
    %123 = vector.multi_reduction <add>, %122, %cst_67 [1] : vector<8x32xf32> to vector<8xf32>
    %124 = vector.shape_cast %123 : vector<8xf32> to vector<8x1xf32>
    %125 = arith.index_cast %arg0 : i32 to index
    %c1_68 = arith.constant 1 : index
    %126 = memref.load %arg11[%125, %c1_68] : memref<2x2xf32, #tpu.memory_space<smem>>
    %127 = vector.broadcast %126 : f32 to vector<8x1xf32>
    %128 = arith.addf %124, %127 : vector<8x1xf32>
    %129 = arith.negf %128 : vector<8x1xf32>
    %130 = math.exp %129 : vector<8x1xf32>
    %cst_69 = arith.constant 1.000000e+00 : f32
    %131 = vector.broadcast %cst_69 : f32 to vector<8x1xf32>
    %132 = arith.addf %131, %130 : vector<8x1xf32>
    %133 = arith.divf %131, %132 : vector<8x1xf32>
    %134 = vector.shape_cast %133 : vector<8x1xf32> to vector<1x1x8xf32>
    %c0_70 = arith.constant 0 : index
    %c0_71 = arith.constant 0 : index
    %c0_72 = arith.constant 0 : index
    %135 = vector.load %arg12[%c0_70, %c0_71, %c0_72] : memref<1x1x8xf32, #tpu.memory_space<vmem>>, vector<1x1x8xf32>
    tpu.vector_store %arg12[%c0_70, %c0_71, %c0_72], %134 {strides = array<i32>} : memref<1x1x8xf32, #tpu.memory_space<vmem>>, vector<1x1x8xf32>,
    return
  }
  func.func @transform_0(%arg0: i32, %arg1: i32) -> (i32, i32, i32, i32) {
    %c0_i32 = arith.constant 0 : i32
    %c0_i32_0 = arith.constant 0 : i32
    %c0_i32_1 = arith.constant 0 : i32
    return %arg0, %arg1, %c0_i32, %c0_i32_0 : i32, i32, i32, i32
  }
  func.func @transform_1(%arg0: i32, %arg1: i32) -> (i32, i32, i32, i32) {
    %c0_i32 = arith.constant 0 : i32
    %c0_i32_0 = arith.constant 0 : i32
    %c0_i32_1 = arith.constant 0 : i32
    %c0_i32_2 = arith.constant 0 : i32
    return %arg0, %c0_i32, %c0_i32_0, %c0_i32_1 : i32, i32, i32, i32
  }
  func.func @transform_2(%arg0: i32, %arg1: i32) -> (i32, i32, i32) {
    %c0_i32 = arith.constant 0 : i32
    %c0_i32_0 = arith.constant 0 : i32
    %c0_i32_1 = arith.constant 0 : i32
    return %arg0, %c0_i32, %c0_i32_0 : i32, i32, i32
  }
  func.func @transform_3(%arg0: i32, %arg1: i32) -> (i32, i32, i32, i32) {
    %c0_i32 = arith.constant 0 : i32
    %c0_i32_0 = arith.constant 0 : i32
    %c0_i32_1 = arith.constant 0 : i32
    %c0_i32_2 = arith.constant 0 : i32
    return %arg0, %c0_i32, %c0_i32_0, %c0_i32_1 : i32, i32, i32, i32
  }
  func.func @transform_4(%arg0: i32, %arg1: i32) -> (i32, i32, i32) {
    %c0_i32 = arith.constant 0 : i32
    %c0_i32_0 = arith.constant 0 : i32
    %c0_i32_1 = arith.constant 0 : i32
    return %arg0, %c0_i32, %c0_i32_0 : i32, i32, i32
  }
  func.func @transform_5(%arg0: i32, %arg1: i32) -> (i32, i32, i32) {
    %c0_i32 = arith.constant 0 : i32
    %c0_i32_0 = arith.constant 0 : i32
    %c0_i32_1 = arith.constant 0 : i32
    return %arg0, %c0_i32, %c0_i32_0 : i32, i32, i32
  }
  func.func @transform_6(%arg0: i32, %arg1: i32) -> (i32, i32, i32) {
    %c0_i32 = arith.constant 0 : i32
    %c0_i32_0 = arith.constant 0 : i32
    %c0_i32_1 = arith.constant 0 : i32
    return %arg0, %c0_i32, %c0_i32_0 : i32, i32, i32
  }
  func.func @transform_7(%arg0: i32, %arg1: i32) -> (i32, i32, i32) {
    %c0_i32 = arith.constant 0 : i32
    %c0_i32_0 = arith.constant 0 : i32
    %c0_i32_1 = arith.constant 0 : i32
    return %arg0, %c0_i32, %c0_i32_0 : i32, i32, i32
  }
  func.func @transform_8(%arg0: i32, %arg1: i32) -> (i32, i32, i32) {
    %c0_i32 = arith.constant 0 : i32
    %c0_i32_0 = arith.constant 0 : i32
    %c0_i32_1 = arith.constant 0 : i32
    return %arg0, %c0_i32, %c0_i32_0 : i32, i32, i32
  }
  func.func @transform_9(%arg0: i32, %arg1: i32) -> (i32, i32) {
    %c0_i32 = arith.constant 0 : i32
    %c0_i32_0 = arith.constant 0 : i32
    %c0_i32_1 = arith.constant 0 : i32
    return %c0_i32, %c0_i32_0 : i32, i32
  }
  func.func @transform_10(%arg0: i32, %arg1: i32) -> (i32, i32, i32) {
    %c0_i32 = arith.constant 0 : i32
    %c0_i32_0 = arith.constant 0 : i32
    return %arg0, %arg1, %c0_i32 : i32, i32, i32
  }
}

</mosaic_0001>

<bundles_post_ra>
// kernel: tpu_custom_call.1
= control target key start
LH: loop header
LB: loop body
LE: loop exit
PB: predicated region body
PF: predicated region fallthrough
CT: control target
= control target key end

     0   :  { %s3311_s0 = inlined_call_operand.vmem [shape: f32[2,8,8,4], index: 0, kind: input, shape index: {}]   ;;  %s3312_s1 = inlined_call_operand.vmem [shape: bf16[2,3,4,32], index: 1, kind: input, shape index: {}]   ;;  %s3313_s2 = inlined_call_operand.vmem [shape: f32[2,1,32], index: 2, kind: input, shape index: {}]   ;;  %s3314_s3 = inlined_call_operand.vmem [shape: bf16[2,3,32,32], index: 3, kind: input, shape index: {}]   ;;  %s3315_s4 = inlined_call_operand.vmem [shape: f32[2,1,32], index: 4, kind: input, shape index: {}]   ;;  %s3316_s5 = inlined_call_operand.vmem [shape: bf16[2,32,32], index: 5, kind: input, shape index: {}]   ;;  %s3317_s6 = inlined_call_operand.vmem [shape: f32[2,1,32], index: 6, kind: input, shape index: {}]   ;;  %s3318_s7 = inlined_call_operand.vmem [shape: f32[2,1,32], index: 7, kind: input, shape index: {}]   ;;  %s3319_s8 = inlined_call_operand.vmem [shape: f32[2,1,32], index: 8, kind: input, shape index: {}]   ;;  %s3320_s9 = inlined_call_operand.vmem [shape: f32[2,2], index: 9, kind: input, shape index: {}]   ;;  %s3321_s10 = inlined_call_operand.hbm [shape: f32[2,1,8], index: 10, kind: output, shape index: {}]  }
   0x1   :  { %3328 = sst [smem:[#allocation8_spill]] %s3311_s0 }
   0x2   :  { %3329 = sst [smem:[#allocation9_spill]] %s3312_s1 }
   0x3   :  { %15 = vsyncpa [#allocation4], 0 }
   0x4   :  { %16 = vsyncpa [#allocation3], 0 }
   0x5   :  { %18 = vsyncpa [#allocation3 + $0x1], 0  ;;  %s2625_s13 = smov 0   ;;  %s2627_s14 = smov 0  }
   0x6   :  { %s2629_s15 = smov 0   ;;  %s2631_s16 = smov 0  }
   0x7   :  { %s2633_s17 = smov 0   ;;  %s2635_s18 = smov 0  }
   0x8 LB: > { %s2159_s19 = sadd.s32 4294967295, %s2565_s18   ;;  %s2160_s20 = sadd.s32 4294967294, %s2565_s18   ;;  %s2565_s18 = sphi %s2635_s18, %s24_s18   ;;  %s2561_s17 = sphi %s2633_s17, %s3391_s17   ;;  %s2557_s16 = sphi %s2631_s16, %s3390_s16   ;;  %s2553_s15 = sphi %s2629_s15, %s3389_s15   ;;  %s2549_s14 = sphi %s2627_s14, %s3388_s14   ;;  %s2545_s13 = sphi %s2625_s13, %s3387_s13  }
   0x9   : > { %s36_s21 = sadd.s32 1, %s2561_s17  ;;  %s302_s22 = sadd.s32 1, %s2553_s15 }
   0xa   : > { %p38_p0 = scmp.ge.s32.totalorder %s36_s21, 2  ;;  %p312_p1 = scmp.ne.s32.totalorder %s2553_s15, %s2549_s14 }
   0xb   : > { %p313_p2 = scmp.eq.s32.totalorder %s2159_s19, 1  ;;  %p318_p3 = scmp.ne.s32.totalorder %s2549_s14, %s2545_s13 }
   0xc   : > { %s3393_s21 = smov (%p38_p0, %s36_s21), 0  ;;  %p319_p5 = scmp.eq.s32.totalorder %s2160_s20, 1 }
   0xd   : > { %p2665_p4 = por %p313_p2, %p312_p1  ;;  %s297_s24 = ssub.s32 %s2561_s17, %s3393_s21 }
   0xe   : > { %p2161_p6 = scmp.ge.s32.totalorder %s2565_s18, 1  ;;  %p300_p7 = scmp.eq.s32.totalorder %s297_s24, 0 }
   0xf   : > { %p2672_p8 = por %p319_p5, %p318_p3  ;;  %p326_p9 = scmp.lt.s32.totalorder %s2565_s18, 3 }
  0x10   : > { %s2678_s26 = scalar_select %p300_p7, %s2553_s15, %s302_s22  }
  0x11   : > { %p2680_p10 = pnand %p2161_p6, %p326_p9  ;;  %p2684_p11 = scmp.eq.s32.totalorder %s2159_s19, 0 }
  0x12   : > { %s339_s11 = sshll.u32 %s3320_s9, 4  ;;  %s340_s11 = int_to_ptr.vmem [resolvable:$true] %s339_s11 }
  0x13   : > { %p2361_p12 = pneg %p2680_p10  ;;  %s2470_s12 = scalar_lea.vmem %s340_s11, 32 }
  0x14   : > { %p2471_p0 = scmp.ne.s32.totalorder %s340_s11, %s2470_s12  ;;  %p2478_p5 = scmp.lt.s32.totalorder %s340_s11, %s340_s11 }
  0x15   : > { %p2362_p13 = pnand %p2684_p11, %p2361_p12  ;;  %p2479_p6 = scmp.lt.s32.totalorder %s2470_s12, %s2470_s12 }
  0x17   : > { %p2472_p1 = pneg %p2362_p13  ;;  %p2480_p7 = por %p2479_p6, %p2478_p5 }
  0x19   : > { %p2473_p2 = pnand %p2472_p1, %p2471_p0 }
  0x1b   : > { %p2474_p3 = pneg %p2473_p2 }
  0x1d   : > { %p2481_p9 = pnand %p2480_p7, %p2474_p3 }
  0x1f   : > { %2484 = shalt.err (!%p2481_p9)
}
  0x20   : > { %s2567_s19 = smov [#allocation2]   ;;  %419 = sbr.rel (%p2680_p10) target bundleno = 1699 (0x6a3), region = 60 }
  0x21   : > { %2364 = dma.vmem_to_smem (!%p2362_p13), %s340_s11, 32, %s2567_s19, [#allocation4]  }
  0x25   : > { %2536 = dma.done.wait (%p2684_p11), [#allocation4], 32  }
  0x26   : > { %2538 = vsyncadd (%p2684_p11), [#allocation4], 4294967264 }
  0x27   : > { %425 = sfence }
  0x28   : > { %p492_p12 = scmp.lt.s32.totalorder %s2557_s16, 1  ;;  %v532_v0 = vlaneseq  ;;  %vm767_vm0 = vcmask 1041408   ;;  %vm754_vm1 = vcmask 31744   ;;  %s3334_s0 = sld [smem:[#allocation8_spill]] }
  0x29   : > { %s3335_s1 = sld [smem:[#allocation9_spill]] }
  0x2a   : > { %s2703_s20 = scalar_select %p492_p12, %s2557_s16, 1  ;;  %v2706_v1 = vshrl.u32 %v532_v0, 7 }
  0x2c   : > { %s2353_s22 = smul.u32 6, %s2703_s20  ;;  %s2228_s24 = sshll.u32 %s2703_s20, 6  ;;  %v534_v2 = vadd.s32 8, %v2706_v1  ;;  %v545_v3 = vand.u32 7, %v2706_v1  ;;  %vm3322_vm2 = vcmp.lt.s32.totalorder %v2706_v1, 1  ;;  %vm3325_vm3 = vcmp.lt.s32.totalorder %v2706_v1, 7 }
  0x2d   : > { %v2720_v4 = vadd.s32 16, %v2706_v1  ;;  %v2723_v5 = vadd.s32 24, %v2706_v1  ;;  %v2726_v6 = vadd.s32 32, %v2706_v1  ;;  %v2729_v7 = vadd.s32 40, %v2706_v1  ;;  %s2354_s19 = smul.u32 48, %s2703_s20  ;;  %s508_s30 = scalar_lea.vmem %s3313_s2, %s2703_s20 }
  0x2e   : > { %s2717_s29 = scalar_lea.vmem %s3334_s0, %s2228_s24  ;;  %v552_v11 = vand.u32 7, %v534_v2  ;;  %vm2745_vm4 = vcmp.ge.s32.totalorder %v545_v3, 1  ;;  %vm2749_vm5 = vcmp.le.s32.totalorder %v545_v3, 6  ;;  %v3348_v2 = vmov 0  ;;  %s2229_s11 = sshll.u32 %s2703_s20, 4 }
  0x2f   : > { %s2734_s12 = scalar_lea.vmem %s3335_s1, %s2353_s22  ;;  %v2737_v8 = vld [vmem:[%s2717_s29] sm:$0xff]  ;;  %v2740_v9 = vld [vmem:[%s2717_s29 + $0x8] sm:$0xff]  ;;  %v655_v24 = vld [vmem:[%s2717_s29 + $0x10] sm:$0xff]  ;;  %v559_v56 = vand.u32 7, %v2720_v4  ;;  %v566_v57 = vand.u32 7, %v2723_v5  ;;  %s2975_s27 = scalar_lea.vmem %s3314_s3, %s2354_s19 }
  0x30   : > { %v2743_v10 = vld [vmem:[%s2717_s29 + $0x20] sm:$0xff]  ;;  %v661_v15 = vrot.slane %v2737_v8, 7  ;;  %v662_v16 = vrot.slane %v2740_v9, 7  ;;  %v702_v17 = vrot.slane %v2737_v8, 1  ;;  %v703_v18 = vrot.slane %v2740_v9, 1  ;;  %v2764_v21 = vld [vmem:[%s2717_s29 + $0x28] sm:$0xff]  ;;  %s521_s22 = scalar_lea.vmem %s3316_s5, %s2229_s11  ;;  %s516_s28 = scalar_lea.vmem %s3315_s4, %s2703_s20 }
  0x31   : > { %v2172_v14 = vld [vmem:[%s2734_s12 + $0x2] sm:$0x3]  ;;  %v748_v20 = vpack.c.bf16 %v2740_v9, %v2737_v8  ;;  %v665_v22 = vrot.slane %v2743_v10, 7  ;;  %v706_v23 = vrot.slane %v2743_v10, 1  ;;  %v2770_v25 = vld [vmem:[%s2717_s29 + $0x18] sm:$0xff]  ;;  %v666_v26 = vrot.slane %v2764_v21, 7  ;;  %s524_s11 = scalar_lea.vmem %s3317_s6, %s2703_s20 }
  0x32   : > { %2349 = vmatprep.subr.msk.bf16.mxu0 %vm767_vm0, %v2172_v14  ;;  %2350 = vmatprep.subr.msk.bf16.mxu1 %vm767_vm0, %v2172_v14  ;;  %v769_v19 = vsel %vm767_vm0, %v2172_v14, 0  ;;  %v707_v27 = vrot.slane %v2764_v21, 1  ;;  %v750_v28 = vpack.c.bf16 %v2764_v21, %v2743_v10  ;;  %v663_v29 = vrot.slane %v655_v24, 7  ;;  %v2777_v30 = vld [vmem:[%s2717_s29 + $0x30] sm:$0xff]  ;;  %v2780_v31 = vld [vmem:[%s2717_s29 + $0x38] sm:$0xff]  ;;  %s2222_s24 = sshll.u32 %s2557_s16, 7 }
  0x33   : > { %2270 = vmatpush3.bf16.msra.mxu0 %v769_v19  ;;  %2348 = vmatpush3.bf16.msra.mxu1 %v769_v19  ;;  %v664_v32 = vrot.slane %v2770_v25, 7  ;;  %v704_v33 = vrot.slane %v655_v24, 1  ;;  %v705_v34 = vrot.slane %v2770_v25, 1  ;;  %v749_v35 = vpack.c.bf16 %v2770_v25, %v655_v24  ;;  %v747_v36 = vld [vmem:[%s2734_s12] sm:$0x3]  ;;  %s2225_s19 = sshll.u32 %s2557_s16, 4 }
  0x34   : > { %2271 = vmatprep.mubr.msk.bf16.mxu0 %vm754_vm1, %v748_v20  ;;  %2275 = vmatprep.mubr.msk.bf16.mxu1 %vm754_vm1, %v750_v28  ;;  %v667_v37 = vrot.slane %v2777_v30, 7  ;;  %v668_v38 = vrot.slane %v2780_v31, 7  ;;  %v708_v39 = vrot.slane %v2777_v30, 1  ;;  %v709_v40 = vrot.slane %v2780_v31, 1  ;;  %v2181_v41 = vld [vmem:[%s2734_s12 + $0x4] sm:$0x3]  ;;  %s1994_s29 = scalar_lea.hbm %s3321_s10, %s2225_s19 }
  0x35   : > { %2351 = vmatprep.subr.msk.bf16.mxu1 %vm767_vm0, %v747_v36  ;;  %v751_v42 = vpack.c.bf16 %v2780_v31, %v2777_v30  ;;  %v849_v43 = vsel %vm767_vm0, %v747_v36, 0  ;;  %2352 = vmatprep.subr.msk.bf16.mxu0 %vm767_vm0, %v2181_v41  ;;  %v935_v44 = vsel %vm767_vm0, %v2181_v41, 0  ;;  %vm2800_vm6 = vcmp.ge.s32.totalorder %v552_v11, 1  ;;  %s489_s12 = sand.u32 1, %s2549_s14  }
  0x36   : > { %2272 = vmatmul.mubr.msk.bf16.vlgmr.msra.gmra.mxu0 %vm754_vm1, %v749_v35  ;;  %v676_v46 = vsel %vm3322_vm2, %v661_v15, %v662_v16  ;;  %v677_v47 = vsel %vm3322_vm2, %v668_v38, %v661_v15  ;;  %vm2810_vm7 = vcmp.le.s32.totalorder %v552_v11, 6  ;;  %v716_v49 = vsel %vm3325_vm3, %v703_v18, %v704_v33 }
  0x37   : > { %2290 = vmatpush3.bf16.msra.mxu0 %v935_v44  ;;  %2276 = vmatmul.mubr.msk.bf16.vlgmr.msra.gmra.mxu1 %vm754_vm1, %v751_v42  ;;  %v694_v50 = vsel %vm2745_vm4, %v677_v47, 0.0  ;;  %v695_v51 = vsel %vm2800_vm6, %v676_v46, 0.0  ;;  %v717_v52 = vsel %vm3325_vm3, %v702_v17, %v703_v18  ;;  %v736_v53 = vsel %vm2810_vm7, %v716_v49, 0.0  ;;  %v2424_v49 = vld [vmem:[%s2975_s27 + $0x18] sm:$0xff]  }
  0x38   : > { %2280 = vmatpush3.bf16.msra.mxu1 %v849_v43  ;;  %v743_v54 = vpack.c.bf16 %v695_v51, %v694_v50  ;;  %v735_v55 = vsel %vm2749_vm5, %v717_v52, 0.0  ;;  %v674_v59 = vsel %vm3322_vm2, %v663_v29, %v664_v32  ;;  %v675_v60 = vsel %vm3322_vm2, %v662_v16, %v663_v29  ;;  %v2425_v50 = vld [vmem:[%s2975_s27 + $0x10] sm:$0xff]   ;;  %v2426_v51 = vld [vmem:[%s2975_s27 + $0x8] sm:$0xff]   ;;  %v2428_v52 = vld [vmem:[%s2975_s27] sm:$0xff]  }
  0x39   : > { %v916_v58 = vpack.c.bf16 %v736_v53, %v735_v55  ;;  %v714_v61 = vsel %vm3325_vm3, %v705_v34, %v706_v23  ;;  %vm2840_vm8 = vcmp.ge.s32.totalorder %v559_v56, 1  ;;  %vm2844_vm9 = vcmp.ge.s32.totalorder %v566_v57, 1  ;;  %2299 = vmatprep.subr.bf16.mxu1 %v2424_v49  ;;  %2311 = vmatprep.subr.bf16.mxu0 %v2426_v51  ;;  %v2982_v53 = vld [vmem:[%s2975_s27 + $0x28] sm:$0xff]  }
  0x3a   : > { %2281 = vmatprep.mubr.msk.bf16.mxu1 %vm754_vm1, %v743_v54  ;;  %vm2848_vm10 = vcmp.le.s32.totalorder %v559_v56, 6  ;;  %vm2852_vm11 = vcmp.le.s32.totalorder %v566_v57, 6  ;;  %v696_v4 = vsel %vm2840_vm8, %v675_v60, 0.0  ;;  %v697_v5 = vsel %vm2844_vm9, %v674_v59, 0.0 }
  0x3b   : > { %v3349_v2 = vsel %vm2848_vm10, 4294967295, %v3348_v2  ;;  %2291 = vmatprep.mubr.msk.bf16.mxu0 %vm754_vm1, %v916_v58  ;;  %v715_v9 = vsel %vm3325_vm3, %v704_v33, %v705_v34  ;;  %v738_v11 = vsel %vm2852_vm11, %v714_v61, 0.0  ;;  %v744_v14 = vpack.c.bf16 %v697_v5, %v696_v4 }
  0x3c   : > { %v737_v15 = vsel %vm2848_vm10, %v715_v9, 0.0  ;;  %v573_v16 = vand.u32 7, %v2726_v6  ;;  %v580_v18 = vand.u32 7, %v2729_v7  ;;  %v672_v20 = vsel %vm3322_vm2, %v665_v22, %v666_v26 }
  0x3d   : > { %v917_v19 = vpack.c.bf16 %v738_v11, %v737_v15  ;;  %v673_v24 = vsel %vm3322_vm2, %v664_v32, %v665_v22  ;;  %v712_v6 = vsel %vm3325_vm3, %v707_v27, %v708_v39  ;;  %v3358_v22 = vmov 0 }
  0x3e   : > { %vm2885_vm12 = vcmp.ge.s32.totalorder %v573_v16, 1  ;;  %vm2889_vm13 = vcmp.ge.s32.totalorder %v580_v18, 1  ;;  %vm2893_vm14 = vcmp.le.s32.totalorder %v573_v16, 6  ;;  %vm2897_vm15 = vcmp.le.s32.totalorder %v580_v18, 6 }
  0x3f   : > { %v3359_v22 = vsel %vm2897_vm15, 4294967295, %v3358_v22  ;;  %2282 = vmatmul.mubr.msk.bf16.vlgmr.msra.gmra.mxu1 %vm754_vm1, %v744_v14  ;;  %2292 = vmatmul.mubr.msk.bf16.vlgmr.msra.gmra.mxu0 %vm754_vm1, %v917_v19  ;;  %v698_v29 = vsel %vm2885_vm12, %v673_v24, 0.0  ;;  %v699_v32 = vsel %vm2889_vm13, %v672_v20, 0.0  ;;  %v713_v33 = vsel %vm3325_vm3, %v706_v23, %v707_v27 }
  0x40   : > { %v740_v34 = vsel %vm2897_vm15, %v712_v6, 0.0  ;;  %v745_v35 = vpack.c.bf16 %v699_v32, %v698_v29  ;;  %v739_v36 = vsel %vm2893_vm14, %v713_v33, 0.0  ;;  %v539_v41 = vadd.s32 48, %v2706_v1  ;;  %2300 = vmatpush3.bf16.msra.mxu1 %v2424_v49  ;;  %2312 = vmatpush3.bf16.msra.mxu0 %v2426_v51  ;;  %v2186_v29 = vld [vmem:[%s508_s30] ss:$0 sm:$0xff]  ;;  %s530_s30 = scalar_lea.vmem %s3319_s8, %s2703_s20 }
  0x41   : > { %v540_v42 = vadd.s32 56, %v2706_v1  ;;  %v918_v43 = vpack.c.bf16 %v740_v34, %v739_v36  ;;  %v670_v10 = vsel %vm3322_vm2, %v667_v37, %v668_v38  ;;  %v671_v23 = vsel %vm3322_vm2, %v666_v26, %v667_v37  ;;  %2301 = vmatprep.subr.bf16.mxu1 %v2425_v50  ;;  %2313 = vmatprep.subr.bf16.mxu0 %v2428_v52 }
  0x42   : > { %2285 = vmatprep.mubr.msk.bf16.mxu1 %vm754_vm1, %v745_v35  ;;  %v587_v27 = vand.u32 7, %v539_v41  ;;  %v711_v46 = vsel %vm3325_vm3, %v708_v39, %v709_v40  ;;  %v718_v21 = vsel %vm3325_vm3, %v709_v40, %v702_v17  ;;  %v3364_v30 = vmov 0 }
  0x43   : > { %v594_v44 = vand.u32 7, %v540_v42  ;;  %2295 = vmatprep.mubr.msk.bf16.mxu0 %vm754_vm1, %v918_v43  ;;  %v3366_v8 = vmov 0  ;;  %vm3368_vm3 = vcmp.lt.s32.totalorder %v2706_v1, 1 }
  0x44   : > { %vm2945_vm0 = vcmp.ge.s32.totalorder %v587_v27, 1  ;;  %vm2953_vm10 = vcmp.le.s32.totalorder %v587_v27, 6  ;;  %2302 = vmatpush3.bf16.msra.mxu1 %v2425_v50  ;;  %2314 = vmatpush3.bf16.msra.mxu0 %v2428_v52 }
  0x45   : > { %vm2949_vm2 = vcmp.ge.s32.totalorder %v594_v44, 1  ;;  %v3365_v30 = vsel %vm2953_vm10, 4294967295, %v3364_v30  ;;  %vm2957_vm15 = vcmp.le.s32.totalorder %v594_v44, 6  ;;  %v700_v17 = vsel %vm2945_vm0, %v671_v23, 0.0  ;;  %2323 = vmatprep.subr.bf16.mxu1 %v2982_v53 }
  0x46   : > { %v3367_v8 = vsel %vm2957_vm15, 4294967295, %v3366_v8  ;;  %v701_v31 = vsel %vm2949_vm2, %v670_v10, 0.0  ;;  %v741_v38 = vsel %vm2953_vm10, %v711_v46, 0.0  ;;  %v742_v39 = vsel %vm2957_vm15, %v718_v21, 0.0  ;;  %vm3369_vm15 = vmmov %vm3368_vm3 }
  0x47   : > { %v746_v40 = vpack.c.bf16 %v701_v31, %v700_v17  ;;  %v919_v47 = vpack.c.bf16 %v742_v39, %v741_v38  ;;  %vm3370_vm10 = vcmp.lt.s32.totalorder %v2706_v1, 7 }
  0x49   : > { %2286 = vmatmul.mubr.msk.bf16.gmra.mxu1 %vm754_vm1, %v746_v40  ;;  %2296 = vmatmul.mubr.msk.bf16.gmra.mxu0 %vm754_vm1, %v919_v47  ;;  %vm1110_vm1 = vcmask 261120  }
  0xf6   : > { %v2273_v54 = vpop.f32.mrf.mxu0 }
  0xf7   : > { %v2277_v55 = vpop.f32.mrf.mxu1 }
  0xf8   : > { %v805_v56 = vpop.f32.mrf.mxu0 }
  0xf9   : > { %v821_v57 = vpop.f32.mrf.mxu1 }
  0xfa   : > { %v2274_v58 = vpop.f32.mrf.mxu0 }
  0xfb   : > { %v2278_v59 = vpop.f32.mrf.mxu1 }
  0xfc   : > { %v808_v60 = vpop.f32.mrf.mxu0 }
  0xfd   : > { %v824_v61 = vpop.f32.mrf.mxu1 }
  0xff   : > { %v2283_v4 = vpop.f32.mrf.mxu1  ;;  %v2293_v5 = vpop.f32.mrf.mxu0 }
 0x100   : > { %v894_v9 = vadd.f32 %v2283_v4, %v2273_v54 }
 0x101   : > { %v885_v11 = vpop.f32.mrf.mxu1  ;;  %v971_v14 = vpop.f32.mrf.mxu0 }
 0x102   : > { %v886_v15 = vadd.f32 %v885_v11, %v805_v56  ;;  %v1004_v20 = vadd.f32 %v2293_v5, %v894_v9 }
 0x103   : > { %v2284_v16 = vpop.f32.mrf.mxu1  ;;  %v2294_v18 = vpop.f32.mrf.mxu0 }
 0x104   : > { %v897_v19 = vadd.f32 %v2284_v16, %v2274_v58  ;;  %v1002_v34 = vadd.f32 %v971_v14, %v886_v15  ;;  %v1019_v42 = vadd.f32 %v2186_v29, %v1004_v20  ;;  %v2429_v16 = vld [vmem:[%s2975_s27 + $0x20] sm:$0xff]   ;;  %s1558_s27 = sld [smem:[#allocation2 + %s2222_s24]] }
 0x105   : > { %v888_v24 = vpop.f32.mrf.mxu1  ;;  %v974_v6 = vpop.f32.mrf.mxu0 }
 0x106   : > { %v1005_v32 = vadd.f32 %v2294_v18, %v897_v19  ;;  %v889_v33 = vadd.f32 %v888_v24, %v808_v60  ;;  %v1017_v44 = vadd.f32 %v2186_v29, %v1002_v34  ;;  %v2991_v38 = vmax.f32 %v1019_v42, 0.0 }
 0x108   : > { %v1020_v35 = vadd.f32 %v2186_v29, %v1005_v32  ;;  %v1003_v43 = vadd.f32 %v974_v6, %v889_v33  ;;  %v2993_v52 = vmax.f32 %v1017_v44, 0.0 }
 0x109   : > { %v2287_v36 = vpop.f32.mrf.mxu1  ;;  %v2297_v41 = vpop.f32.mrf.mxu0 }
 0x10a   : > { %v910_v10 = vadd.f32 %v2287_v36, %v2277_v55  ;;  %v2989_v46 = vmax.f32 %v1020_v35, 0.0  ;;  %v1018_v21 = vadd.f32 %v2186_v29, %v1003_v43  ;;  %v1057_v18 = vrot.slane %v2993_v52, 1 }
 0x10b   : > { %v901_v23 = vpop.f32.mrf.mxu1  ;;  %v987_v27 = vpop.f32.mrf.mxu0  ;;  %v1033_v24 = vrot.slane %v2993_v52, 7 }
 0x10c   : > { %v902_v17 = vadd.f32 %v901_v23, %v821_v57  ;;  %v1026_v39 = vmax.f32 %v1018_v21, 0.0  ;;  %v1008_v49 = vadd.f32 %v2297_v41, %v910_v10  ;;  %v1036_v54 = vrot.slane %v2989_v46, 7 }
 0x10d   : > { %v2288_v31 = vpop.f32.mrf.mxu1  ;;  %v2298_v50 = vpop.f32.mrf.mxu0  ;;  %v1035_v57 = vrot.slane %v2991_v38, 7  ;;  %v1090_v9 = vpack.c.bf16 %v2989_v46, %v2991_v38  ;;  %v1060_v42 = vrot.slane %v2989_v46, 1 }
 0x10e   : > { %v1006_v40 = vadd.f32 %v987_v27, %v902_v17  ;;  %v913_v47 = vadd.f32 %v2288_v31, %v2278_v59  ;;  %v1034_v55 = vrot.slane %v1026_v39, 7  ;;  %v1058_v4 = vrot.slane %v1026_v39, 1 }
 0x10f   : > { %v904_v51 = vpop.f32.mrf.mxu1  ;;  %v1089_v5 = vpack.c.bf16 %v1026_v39, %v2993_v52  ;;  %v1059_v59 = vrot.slane %v2991_v38, 1  ;;  %v1023_v11 = vadd.f32 %v2186_v29, %v1008_v49  ;;  %v990_v15 = vpop.f32.mrf.mxu0  ;;  %v1045_v19 = vsel %vm3368_vm3, %v1035_v57, %v1036_v54  ;;  %vm3371_vm3 = vmmov %vm3370_vm10  ;;  %v2430_v52 = vld [vmem:[%s521_s22 + $0x8] sm:$0xff]  }
 0x110   : > { %v1021_v56 = vadd.f32 %v2186_v29, %v1006_v40  ;;  %v1009_v58 = vadd.f32 %v2298_v50, %v913_v47  ;;  %v905_v60 = vadd.f32 %v904_v51, %v824_v61  ;;  %v1046_v6 = vsel %vm3369_vm15, %v1034_v55, %v1035_v57  ;;  %2335 = vmatprep.subr.bf16.mxu0 %v2430_v52 }
 0x111   : > { %2303 = vmatprep.mubr.msk.bf16.mxu1 %vm1110_vm1, %v1089_v5  ;;  %v1070_v35 = vsel %vm3370_vm10, %v1058_v4, %v1059_v59  ;;  %v1071_v36 = vsel %vm3371_vm3, %v1057_v18, %v1058_v4  ;;  %v1052_v41 = vsel %vm2844_vm9, %v1045_v19, 0.0  ;;  %v1031_v43 = vmax.f32 %v1023_v11, 0.0  ;;  %vm3372_vm9 = vmmov %vm3369_vm15 }
 0x112   : > { %v1029_v14 = vmax.f32 %v1021_v56, 0.0  ;;  %v1024_v61 = vadd.f32 %v2186_v29, %v1009_v58  ;;  %v1007_v20 = vadd.f32 %v990_v15, %v905_v60  ;;  %2304 = vmatmul.mubr.msk.bf16.vlgmr.msra.gmra.mxu1 %vm1110_vm1, %v1090_v9  ;;  %v1047_v23 = vsel %vm3369_vm15, %v1033_v24, %v1034_v55  ;;  %vm3378_vm10 = vmmov %vm3371_vm3 }
 0x113   : > { %2324 = vmatpush3.bf16.msra.mxu1 %v2982_v53  ;;  %v1073_v44 = vsel %vm2749_vm5, %v1071_v36, 0.0  ;;  %v1074_v63 = vsel %vm2810_vm7, %v1070_v35, 0.0  ;;  %v1039_v38 = vrot.slane %v1031_v43, 7  ;;  %v1050_v13 = vsel %vm2800_vm6, %v1047_v23, 0.0  ;;  %vm3375_vm7 = vmmov %vm3371_vm3 }
 0x114   : > { %v1037_v32 = vrot.slane %v1029_v14, 7  ;;  %v1032_v33 = vmax.f32 %v1024_v61, 0.0  ;;  %v1022_v34 = vadd.f32 %v2186_v29, %v1007_v20  ;;  %2325 = vmatprep.subr.bf16.mxu1 %v2429_v16  ;;  %v1051_v29 = vsel %vm2840_vm8, %v1046_v6, 0.0  ;;  %vm3373_vm8 = vmmov %vm3372_vm9 }
 0x115   : > { %v1061_v27 = vrot.slane %v1029_v14, 1  ;;  %v1063_v48 = vrot.slane %v1031_v43, 1  ;;  %v1277_v49 = vpack.c.bf16 %v1074_v63, %v1073_v44  ;;  %vm3374_vm5 = vmmov %vm3373_vm8  ;;  %v1082_v51 = vpack.c.bf16 %v1052_v41, %v1051_v29 }
 0x116   : > { %v1040_v10 = vrot.slane %v1032_v33, 7  ;;  %v1030_v53 = vmax.f32 %v1022_v34, 0.0  ;;  %v1044_v46 = vsel %vm3372_vm9, %v1036_v54, %v1037_v32  ;;  %v1092_v39 = vpack.c.bf16 %v1032_v33, %v1031_v43  ;;  %vm3377_vm6 = vmmov %vm3371_vm3 }
 0x117   : > { %2326 = vmatpush3.bf16.msra.mxu1 %v2429_v16  ;;  %v1068_v54 = vsel %vm3375_vm7, %v1060_v42, %v1061_v27  ;;  %v1053_v12 = vsel %vm2885_vm12, %v1044_v46, 0.0  ;;  %v1069_v60 = vsel %vm3378_vm10, %v1059_v59, %v1060_v42  ;;  %vm3379_vm12 = vmmov %vm3374_vm5  ;;  %v1064_v57 = vrot.slane %v1032_v33, 1 }
 0x118   : > { %v1038_v21 = vrot.slane %v1030_v53, 7  ;;  %v1062_v17 = vrot.slane %v1030_v53, 1  ;;  %v1091_v31 = vpack.c.bf16 %v1030_v53, %v1029_v14  ;;  %v1048_v62 = vsel %vm3373_vm8, %v1040_v10, %v1033_v24 }
 0x119   : > { %v1049_v40 = vsel %vm2745_vm4, %v1048_v62, 0.0  ;;  %vm3376_vm4 = vmmov %vm3371_vm3  ;;  %v1076_v25 = vsel %vm2852_vm11, %v1068_v54, 0.0  ;;  %vm3382_vm15 = vnez %v3349_v2  ;;  %vm1610_vm9 = vcmask 1041409  }
 0x11a   : > { %2307 = vmatprep.mubr.msk.bf16.mxu1 %vm1110_vm1, %v1091_v31  ;;  %v1081_v47 = vpack.c.bf16 %v1050_v13, %v1049_v40  ;;  %v1043_v50 = vsel %vm3374_vm5, %v1037_v32, %v1038_v21  ;;  %v1066_v56 = vsel %vm3376_vm4, %v1062_v17, %v1063_v48  ;;  %v1067_v58 = vsel %vm3377_vm6, %v1061_v27, %v1062_v17  ;;  %vm3381_vm3 = vmmov %vm3374_vm5 }
 0x11b   : > { %2308 = vmatmul.mubr.msk.bf16.gmra.mxu1 %vm1110_vm1, %v1092_v39  ;;  %v1054_v45 = vsel %vm2889_vm13, %v1043_v50, 0.0  ;;  %v1042_v7 = vsel %vm3379_vm12, %v1038_v21, %v1039_v38  ;;  %v1077_v4 = vsel %vm2893_vm14, %v1067_v58, 0.0  ;;  %vm3380_vm13 = vnez %v3359_v22  ;;  %vm3383_vm11 = vmmov %vm3376_vm4  ;;  %v2213_v21 = vld [vmem:[%s516_s28] ss:$0 sm:$0xff] }
 0x11c   : > { %2315 = vmatprep.mubr.msk.bf16.mxu0 %vm1110_vm1, %v1081_v47  ;;  %2327 = vmatprep.mubr.msk.bf16.mxu1 %vm1110_vm1, %v1277_v49  ;;  %v1083_v55 = vpack.c.bf16 %v1054_v45, %v1053_v12  ;;  %v1078_v5 = vsel %vm3380_vm13, %v1066_v56, 0.0  ;;  %v1041_v59 = vsel %vm3381_vm3, %v1039_v38, %v1040_v10  ;;  %v1075_v9 = vsel %vm3382_vm15, %v1069_v60, 0.0  ;;  %vm3384_vm14 = vmmov %vm3376_vm4 }
 0x11d   : > { %2316 = vmatmul.mubr.msk.bf16.vlgmr.msra.gmra.mxu0 %vm1110_vm1, %v1082_v51  ;;  %v1055_v3 = vsel %vm2945_vm0, %v1042_v7, 0.0  ;;  %v1278_v11 = vpack.c.bf16 %v1076_v25, %v1075_v9  ;;  %v1279_v14 = vpack.c.bf16 %v1078_v5, %v1077_v4  ;;  %v1056_v15 = vsel %vm2949_vm2, %v1041_v59, 0.0 }
 0x11e   : > { %2319 = vmatprep.mubr.msk.bf16.mxu0 %vm1110_vm1, %v1083_v55  ;;  %v1084_v28 = vpack.c.bf16 %v1056_v15, %v1055_v3  ;;  %v1065_v22 = vsel %vm3383_vm11, %v1063_v48, %v1064_v57  ;;  %v1072_v2 = vsel %vm3384_vm14, %v1064_v57, %v1057_v18  ;;  %vm3385_vm0 = vnez %v3365_v30  ;;  %v2431_v18 = vld [vmem:[%s521_s22] sm:$0xff]   ;;  %s527_s22 = scalar_lea.vmem %s3318_s7, %s2703_s20  ;;  %s1964_s20 = sadd.s32 1, %s2222_s24 }
 0x11f   : > { %v1079_v26 = vsel %vm3385_vm0, %v1065_v22, 0.0  ;;  %vm3386_vm2 = vnez %v3367_v8  ;;  %2336 = vmatpush3.bf16.msra.mxu0 %v2430_v52  ;;  %vm1612_vm8 = vcmask 1042434   ;;  %vm1614_vm5 = vcmask 1043459  }
 0x120   : > { %v1080_v37 = vsel %vm3386_vm2, %v1072_v2, 0.0  ;;  %2337 = vmatprep.subr.bf16.mxu0 %v2431_v18  ;;  %vm1616_vm7 = vcmask 1044484   ;;  %vm1618_vm4 = vcmask 1045509   ;;  %vm1620_vm6 = vcmask 1046534  }
 0x121   : > { %v1280_v16 = vpack.c.bf16 %v1080_v37, %v1079_v26  ;;  %vm1622_vm10 = vcmask 1047559   ;;  %vm1625_vm12 = vcmask 64512   ;;  %vm1980_vm13 = vcmask 57344  }
 0x123   : > { %2328 = vmatmul.mubr.msk.bf16.vlgmr.msra.gmra.mxu1 %vm1110_vm1, %v1278_v11  ;;  %2338 = vmatpush3.bf16.msra.mxu0 %v2431_v18  ;;  %v2214_v18 = vld [vmem:[%s524_s11] ss:$0 sm:$0xff]  ;;  %s1965_s11 = sld [smem:[#allocation2 + %s1964_s20]] }
 0x124   : > { %2331 = vmatprep.mubr.msk.bf16.mxu1 %vm1110_vm1, %v1279_v14 }
 0x125   : > { %2320 = vmatmul.mubr.msk.bf16.gmra.mxu0 %vm1110_vm1, %v1084_v28 }
 0x12b   : > { %2332 = vmatmul.mubr.msk.bf16.gmra.mxu1 %vm1110_vm1, %v1280_v16 }
 0x1d2   : > { %v2305_v30 = vpop.f32.mrf.mxu1 }
 0x1d4   : > { %v1157_v19 = vpop.f32.mrf.mxu1 }
 0x1d6   : > { %v2306_v61 = vpop.f32.mrf.mxu1 }
 0x1d8   : > { %v1160_v8 = vpop.f32.mrf.mxu1 }
 0x1db   : > { %v2309_v20 = vpop.f32.mrf.mxu1 }
 0x1dd   : > { %v1173_v24 = vpop.f32.mrf.mxu1  ;;  %v2317_v6 = vpop.f32.mrf.mxu0 }
 0x1de   : > { %v1255_v43 = vadd.f32 %v2317_v6, %v2305_v30 }
 0x1df   : > { %v2310_v32 = vpop.f32.mrf.mxu1  ;;  %v1246_v33 = vpop.f32.mrf.mxu0 }
 0x1e0   : > { %v1247_v42 = vadd.f32 %v1246_v33, %v1157_v19 }
 0x1e1   : > { %v1176_v34 = vpop.f32.mrf.mxu1  ;;  %v2318_v35 = vpop.f32.mrf.mxu0 }
 0x1e2   : > { %v1258_v53 = vadd.f32 %v2318_v35, %v2306_v61 }
 0x1e3   : > { %v1249_v36 = vpop.f32.mrf.mxu0  ;;  %v2329_v41 = vpop.f32.mrf.mxu1 }
 0x1e4   : > { %v1377_v27 = vadd.f32 %v2329_v41, %v1255_v43  ;;  %v1250_v46 = vadd.f32 %v1249_v36, %v1160_v8 }
 0x1e5   : > { %v2321_v29 = vpop.f32.mrf.mxu0  ;;  %v1344_v10 = vpop.f32.mrf.mxu1 }
 0x1e6   : > { %v1375_v23 = vadd.f32 %v1344_v10, %v1247_v42  ;;  %v3098_v13 = vadd.f32 %v2213_v21, %v1377_v27  ;;  %v1271_v50 = vadd.f32 %v2321_v29, %v2309_v20  ;;  %v2221_v29 = vld [vmem:[%s527_s22] ss:$0 sm:$0xff]  ;;  %s490_s22 = scalar_lea.vmem [#allocation5], %s489_s12 }
 0x1e7   : > { %v1262_v44 = vpop.f32.mrf.mxu0  ;;  %v2330_v63 = vpop.f32.mrf.mxu1 }
 0x1e8   : > { %v1378_v17 = vadd.f32 %v2330_v63, %v1258_v53  ;;  %v3094_v38 = vadd.f32 %v2213_v21, %v1375_v23  ;;  %v1263_v47 = vadd.f32 %v1262_v44, %v1173_v24  ;;  %v1400_v60 = vmax.f32 %v3098_v13, 0.0 }
 0x1e9   : > { %v2322_v31 = vpop.f32.mrf.mxu0  ;;  %v1347_v62 = vpop.f32.mrf.mxu1 }
 0x1ea   : > { %v3096_v39 = vadd.f32 %v2213_v21, %v1378_v17  ;;  %v1376_v40 = vadd.f32 %v1347_v62, %v1250_v46  ;;  %v1398_v45 = vmax.f32 %v3094_v38, 0.0  ;;  %v1274_v55 = vadd.f32 %v2322_v31, %v2310_v32 }
 0x1eb   : > { %v2333_v48 = vpop.f32.mrf.mxu1  ;;  %v1265_v54 = vpop.f32.mrf.mxu0 }
 0x1ec   : > { %v3100_v49 = vadd.f32 %v2213_v21, %v1376_v40  ;;  %v1401_v51 = vmax.f32 %v3096_v39, 0.0  ;;  %v1381_v7 = vadd.f32 %v2333_v48, %v1271_v50  ;;  %v1266_v4 = vadd.f32 %v1265_v54, %v1176_v34 }
 0x1ed   : > { %v1360_v12 = vpop.f32.mrf.mxu1 }
 0x1ee   : > { %v1399_v56 = vmax.f32 %v3100_v49, 0.0  ;;  %v1379_v58 = vadd.f32 %v1360_v12, %v1263_v47  ;;  %v1407_v59 = vpack.c.bf16 %v1401_v51, %v1400_v60  ;;  %v3119_v15 = vadd.f32 %v2213_v21, %v1381_v7 }
 0x1ef   : > { %v2334_v25 = vpop.f32.mrf.mxu1 }
 0x1f0   : > { %v1406_v57 = vpack.c.bf16 %v1399_v56, %v1398_v45  ;;  %v1382_v5 = vadd.f32 %v2334_v25, %v1274_v55  ;;  %v3114_v3 = vadd.f32 %v2213_v21, %v1379_v58  ;;  %v1404_v37 = vmax.f32 %v3119_v15, 0.0 }
 0x1f1   : > { %v1363_v9 = vpop.f32.mrf.mxu1 }
 0x1f2   : > { %v3116_v11 = vadd.f32 %v2213_v21, %v1382_v5  ;;  %v1380_v14 = vadd.f32 %v1363_v9, %v1266_v4  ;;  %2339 = vmatprep.mubr.msk.bf16.mxu0 %vm1110_vm1, %v1406_v57  ;;  %v1402_v2 = vmax.f32 %v3114_v3, 0.0 }
 0x1f3   : > { %2340 = vmatmul.mubr.msk.bf16.vlgmr.msra.gmra.mxu0 %vm1110_vm1, %v1407_v59 }
 0x1f4   : > { %v3122_v28 = vadd.f32 %v2213_v21, %v1380_v14  ;;  %v1405_v22 = vmax.f32 %v3116_v11, 0.0  ;;  %v1577_v14 = vand.u32 127, %v532_v0 }
 0x1f6   : > { %v1403_v26 = vmax.f32 %v3122_v28, 0.0  ;;  %v1409_v52 = vpack.c.bf16 %v1405_v22, %v1404_v37 }
 0x1f8   : > { %v1408_v16 = vpack.c.bf16 %v1403_v26, %v1402_v2 }
 0x1fa   : > { %2343 = vmatprep.mubr.msk.bf16.mxu0 %vm1110_vm1, %v1408_v16 }
 0x1fb   : > { %2344 = vmatmul.mubr.msk.bf16.gmra.mxu0 %vm1110_vm1, %v1409_v52  ;;  %v1559_v52 = vstv %s1558_s27  ;;  %s1996_s27 = sshll.u32 %s490_s22, 4  ;;  %s1997_s27 = int_to_ptr.vmem [resolvable:$true] %s1996_s27 }
 0x1fc   : > { %s2485_s20 = scalar_lea.vmem %s1997_s27, 16 }
 0x1fd   : > { %p2486_p10 = scmp.ne.s32.totalorder %s1997_s27, %s2485_s20 }
 0x1ff   : > { %p2487_p11 = pnand %p2486_p10, %p2665_p4 }
 0x201   : > { %p2488_p13 = pneg %p2487_p11 }
 0x2b3   : > { %v2341_v30 = vpop.f32.mrf.mxu0 }
 0x2b4   : > { %v1488_v19 = vadd.f32 %v2341_v30, %v2214_v18  ;;  %v3159_v30 = vsub.s32 %v1577_v14, %v2706_v1 }
 0x2b5   : > { %v1479_v61 = vpop.f32.mrf.mxu0 }
 0x2b6   : > { %2432 = vtanh.f32 %v1488_v19  ;;  %v1480_v8 = vadd.f32 %v2214_v18, %v1479_v61 }
 0x2b7   : > { %v2342_v20 = vpop.f32.mrf.mxu0 }
 0x2b8   : > { %2434 = vtanh.f32 %v1480_v8  ;;  %v1491_v24 = vadd.f32 %v2342_v20, %v2214_v18 }
 0x2b9   : > { %v1482_v6 = vpop.f32.mrf.mxu0 }
 0x2ba   : > { %2436 = vtanh.f32 %v1491_v24  ;;  %v1483_v32 = vadd.f32 %v2214_v18, %v1482_v6 }
 0x2bb   : > { %v2345_v33 = vpop.f32.mrf.mxu0 }
 0x2bc   : > { %2438 = vtanh.f32 %v1483_v32  ;;  %v1504_v34 = vadd.f32 %v2345_v33, %v2214_v18 }
 0x2bd   : > { %v1495_v35 = vpop.f32.mrf.mxu0 }
 0x2be   : > { %v1496_v36 = vadd.f32 %v2214_v18, %v1495_v35  ;;  %2440 = vtanh.f32 %v1504_v34 }
 0x2bf   : > { %v2346_v41 = vpop.f32.mrf.mxu0 }
 0x2c0   : > { %2442 = vtanh.f32 %v1496_v36  ;;  %v1507_v42 = vadd.f32 %v2346_v41, %v2214_v18 }
 0x2c1   : > { %v1498_v43 = vpop.f32.mrf.mxu0 }
 0x2c2   : > { %v1499_v10 = vadd.f32 %v2214_v18, %v1498_v43  ;;  %2444 = vtanh.f32 %v1507_v42 }
 0x2c3   : > { %v2433_v53 = vpop.eup %2432 }
 0x2c4   : > { %2446 = vtanh.f32 %v1499_v10  ;;  %v1527_v23 = vmul.f32 %v2433_v53, %v2221_v29 }
 0x2c5   : > { %v2435_v27 = vpop.eup %2434 }
 0x2c6   : > { %v1539_v44 = vsel %vm1110_vm1, %v1527_v23, 0.0  ;;  %v1525_v63 = vmul.f32 %v2435_v27, %v2221_v29 }
 0x2c7   : > { %v2437_v46 = vpop.eup %2436  ;;  %1540 = vadd.xlane.f32.xlu1 %v1539_v44 }
 0x2c8   : > { %v1533_v21 = vsel %vm1110_vm1, %v1525_v63, 0.0  ;;  %v1528_v17 = vmul.f32 %v2437_v46, %v2221_v29 }
 0x2c9   : > { %v2439_v31 = vpop.eup %2438  ;;  %1534 = vadd.xlane.f32.xlu0 %v1533_v21 }
 0x2ca   : > { %v1542_v62 = vsel %vm1110_vm1, %v1528_v17, 0.0  ;;  %v1526_v40 = vmul.f32 %v2439_v31, %v2221_v29 }
 0x2cb   : > { %1543 = vadd.xlane.f32.xlu1 %v1542_v62  ;;  %v2441_v48 = vpop.eup %2440 }
 0x2cc   : > { %v1536_v47 = vsel %vm1110_vm1, %v1526_v40, 0.0  ;;  %v1531_v58 = vmul.f32 %v2441_v48, %v2221_v29 }
 0x2cd   : > { %v2443_v50 = vpop.eup %2442  ;;  %1537 = vadd.xlane.f32.xlu0 %v1536_v47  ;;  %v2568_v47 = vmov 0  }
 0x2ce   : > { %v1529_v54 = vmul.f32 %v2443_v50, %v2221_v29  ;;  %v1551_v4 = vsel %vm1110_vm1, %v1531_v58, 0.0  ;;  %2423 = vset.pattern.permute.xlu0 %v2568_v47  ;;  %2422 = vset.pattern.permute.xlu1 %v2568_v47  ;;  %v1632_v50 = vsub.s32 0, %v2706_v1 }
 0x2cf   : > { %v2445_v12 = vpop.eup %2444 }
 0x2d0   : > { %v1545_v55 = vsel %vm1110_vm1, %v1529_v54, 0.0  ;;  %v1532_v5 = vmul.f32 %v2445_v12, %v2221_v29  ;;  %v1636_v54 = vsub.s32 1, %v2706_v1  ;;  %v1640_v12 = vsub.s32 2, %v2706_v1 }
 0x2d1   : > { %v2447_v7 = vpop.eup %2446  ;;  %1546 = vadd.xlane.f32.xlu0 %v1545_v55  ;;  %v1644_v55 = vsub.s32 3, %v2706_v1 }
 0x2d2   : > { %v1530_v25 = vmul.f32 %v2447_v7, %v2221_v29  ;;  %v1554_v59 = vsel %vm1110_vm1, %v1532_v5, 0.0 }
 0x2d4   : > { %v1548_v57 = vsel %vm1110_vm1, %v1530_v25, 0.0 }
 0x2d5   : > { %1549 = vadd.xlane.f32.xlu1 %v1548_v57  ;;  %1552 = vadd.xlane.f32.xlu0 %v1551_v4  ;;  %v1648_v4 = vsub.s32 4, %v2706_v1 }
 0x2d9   : > { %1555 = vadd.xlane.f32.xlu1 %v1554_v59 }
 0x350   : > { %v1541_v9 = vpop.xlane.xlu1 %1540 }
 0x351   : > { %v1562_v19 = vadd.f32 %v1559_v52, %v1541_v9 }
 0x352   : > { %v1535_v16 = vpop.xlane.xlu0 %1534 }
 0x353   : > { %v1560_v18 = vadd.f32 %v1559_v52, %v1535_v16  ;;  %v1589_v33 = vrot.slane %v1562_v19, %v3159_v30 }
 0x354   : > { %v1544_v61 = vpop.xlane.xlu1 %1543 }
 0x355   : > { %v1581_v24 = vrot.slane %v1560_v18, %v3159_v30  ;;  %v1563_v6 = vadd.f32 %v1559_v52, %v1544_v61  ;;  %v1652_v61 = vsub.s32 5, %v2706_v1 }
 0x356   : > { %v1538_v8 = vpop.xlane.xlu0 %1537 }
 0x357   : > { %v1561_v20 = vadd.f32 %v1559_v52, %v1538_v8  ;;  %v1593_v41 = vrot.slane %v1563_v6, %v3159_v30 }
 0x359   : > { %v1585_v32 = vrot.slane %v1561_v20, %v3159_v30 }
 0x35a   : > { %v1547_v0 = vpop.xlane.xlu0 %1546 }
 0x35b   : > { %v1611_v34 = vsel %vm1610_vm9, %v1585_v32, %v1581_v24  ;;  %v1564_v35 = vadd.f32 %v1559_v52, %v1547_v0 }
 0x35c   : > { %v1613_v36 = vsel %vm1612_vm8, %v1589_v33, %v1611_v34  ;;  %v1656_v33 = vsub.s32 6, %v2706_v1 }
 0x35d   : > { %v1597_v42 = vrot.slane %v1564_v35, %v3159_v30  ;;  %v1615_v10 = vsel %vm1614_vm5, %v1593_v41, %v1613_v36 }
 0x35e   : > { %v1550_v43 = vpop.xlane.xlu1 %1549  ;;  %v1553_v29 = vpop.xlane.xlu0 %1552 }
 0x35f   : > { %v1565_v53 = vadd.f32 %v1559_v52, %v1550_v43  ;;  %v1566_v23 = vadd.f32 %v1559_v52, %v1553_v29  ;;  %v1617_v44 = vsel %vm1616_vm7, %v1597_v42, %v1615_v10 }
 0x361   : > { %v1601_v27 = vrot.slane %v1565_v53, %v3159_v30  ;;  %v1605_v63 = vrot.slane %v1566_v23, %v3159_v30 }
 0x362   : > { %v1556_v46 = vpop.xlane.xlu1 %1555 }
 0x363   : > { %v1567_v21 = vadd.f32 %v1559_v52, %v1556_v46  ;;  %v1619_v17 = vsel %vm1618_vm4, %v1601_v27, %v1617_v44 }
 0x364   : > { %v1621_v62 = vsel %vm1620_vm6, %v1605_v63, %v1619_v17 }
 0x365   : > { %v1609_v31 = vrot.slane %v1567_v21, %v3159_v30 }
 0x367   : > { %v1623_v40 = vsel %vm1622_vm10, %v1609_v31, %v1621_v62 }
 0x368   : > { %v1626_v48 = vsel %vm1625_vm12, %v1623_v40, -inf }
 0x369   : > { %1627 = vmax.xlane.f32.xlu0 %v1626_v48 }
 0x3f2   : > { %v1628_v58 = vpop.xlane.xlu0 %1627 }
 0x3f3   : > { %v1633_v7 = vrot.slane %v1628_v58, %v1632_v50  ;;  %v1637_v25 = vrot.slane %v1628_v58, %v1636_v54  ;;  %v1641_v57 = vrot.slane %v1628_v58, %v1640_v12  ;;  %v1645_v5 = vrot.slane %v1628_v58, %v1644_v55 }
 0x3f4   : > { %v1649_v8 = vrot.slane %v1628_v58, %v1648_v4  ;;  %v1653_v0 = vrot.slane %v1628_v58, %v1652_v61 }
 0x3f5   : > { %v1670_v59 = vsub.f32 %v1560_v18, %v1633_v7  ;;  %v1671_v9 = vsub.f32 %v1561_v20, %v1637_v25  ;;  %v1672_v14 = vsub.f32 %v1562_v19, %v1641_v57  ;;  %v1673_v24 = vsub.f32 %v1563_v6, %v1645_v5 }
 0x3f6   : > { %v1674_v34 = vsub.f32 %v1564_v35, %v1649_v8  ;;  %v1660_v19 = vsub.s32 7, %v2706_v1  ;;  %v1657_v20 = vrot.slane %v1628_v58, %v1656_v33  ;;  %v1675_v36 = vsub.f32 %v1565_v53, %v1653_v0 }
 0x3f7   : > { %v1678_v16 = vmul.f32 1.442695, %v1670_v59  ;;  %v1680_v52 = vmul.f32 1.442695, %v1671_v9  ;;  %v1682_v32 = vmul.f32 1.442695, %v1672_v14 }
 0x3f8   : > { %v1684_v18 = vmul.f32 1.442695, %v1673_v24  ;;  %v1686_v41 = vmul.f32 1.442695, %v1674_v34  ;;  %v1661_v6 = vrot.slane %v1628_v58, %v1660_v19  ;;  %v1676_v42 = vsub.f32 %v1566_v23, %v1657_v20 }
 0x3f9   : > { %2448 = vpow2.f32 %v1678_v16  ;;  %v1688_v43 = vmul.f32 1.442695, %v1675_v36 }
 0x3fa   : > { %2450 = vpow2.f32 %v1680_v52  ;;  %v1677_v35 = vsub.f32 %v1567_v21, %v1661_v6  ;;  %v1690_v27 = vmul.f32 1.442695, %v1676_v42 }
 0x3fb   : > { %2452 = vpow2.f32 %v1682_v32 }
 0x3fc   : > { %2454 = vpow2.f32 %v1684_v18  ;;  %v1692_v63 = vmul.f32 1.442695, %v1677_v35 }
 0x3fd   : > { %2456 = vpow2.f32 %v1686_v41 }
 0x3fe   : > { %2458 = vpow2.f32 %v1688_v43 }
 0x3ff   : > { %2460 = vpow2.f32 %v1690_v27 }
 0x400   : > { %2462 = vpow2.f32 %v1692_v63 }
 0x406   : > { %v2449_v29 = vpop.eup %2448 }
 0x407   : > { %v2451_v10 = vpop.eup %2450  ;;  %1703 = vperm.xlu1 %2422, %v2449_v29  }
 0x408   : > { %1706 = vperm.xlu0 %2423, %v2451_v10   ;;  %v2453_v44 = vpop.eup %2452 }
 0x409   : > { %v2455_v53 = vpop.eup %2454 }
 0x40a   : > { %v2457_v46 = vpop.eup %2456 }
 0x40b   : > { %1709 = vperm.xlu1 %2422, %v2453_v44   ;;  %v2459_v17 = vpop.eup %2458 }
 0x40c   : > { %v2461_v23 = vpop.eup %2460 }
 0x40d   : > { %v2463_v31 = vpop.eup %2462 }
 0x40f   : > { %1712 = vperm.xlu1 %2422, %v2455_v53  }
 0x413   : > { %1715 = vperm.xlu1 %2422, %v2457_v46  }
 0x417   : > { %1718 = vperm.xlu1 %2422, %v2459_v17  }
 0x41b   : > { %1721 = vperm.xlu1 %2422, %v2461_v23  }
 0x41f   : > { %1724 = vperm.xlu1 %2422, %v2463_v31  }
 0x482   : > { %v1704_v62 = vpop.permute.xlu1 %1703 }
 0x483   : > { %v1707_v47 = vpop.permute.xlu0 %1706  ;;  %v1729_v25 = vrot.slane %v1704_v62, %v3159_v30 }
 0x484   : > { %v1733_v7 = vrot.slane %v1707_v47, %v3159_v30 }
 0x486   : > { %v1710_v40 = vpop.permute.xlu1 %1709  ;;  %v1758_v14 = vsel %vm1610_vm9, %v1733_v7, %v1729_v25 }
 0x487   : > { %v1737_v57 = vrot.slane %v1710_v40, %v3159_v30 }
 0x489   : > { %v1759_v52 = vsel %vm1612_vm8, %v1737_v57, %v1758_v14 }
 0x48a   : > { %v1713_v21 = vpop.permute.xlu1 %1712 }
 0x48b   : > { %v1741_v5 = vrot.slane %v1713_v21, %v3159_v30 }
 0x48d   : > { %v1760_v24 = vsel %vm1614_vm5, %v1741_v5, %v1759_v52 }
 0x48e   : > { %v1716_v48 = vpop.permute.xlu1 %1715 }
 0x48f   : > { %v1745_v59 = vrot.slane %v1716_v48, %v3159_v30 }
 0x491   : > { %v1761_v32 = vsel %vm1616_vm7, %v1745_v59, %v1760_v24 }
 0x492   : > { %v1719_v58 = vpop.permute.xlu1 %1718 }
 0x493   : > { %v1749_v16 = vrot.slane %v1719_v58, %v3159_v30 }
 0x495   : > { %v1762_v34 = vsel %vm1618_vm4, %v1749_v16, %v1761_v32 }
 0x496   : > { %v1722_v9 = vpop.permute.xlu1 %1721 }
 0x497   : > { %v1753_v8 = vrot.slane %v1722_v9, %v3159_v30 }
 0x499   : > { %v1763_v20 = vsel %vm1620_vm6, %v1753_v8, %v1762_v34 }
 0x49a   : > { %v1725_v0 = vpop.permute.xlu1 %1724 }
 0x49b   : > { %v1757_v18 = vrot.slane %v1725_v0, %v3159_v30 }
 0x49d   : > { %v1764_v36 = vsel %vm1622_vm10, %v1757_v18, %v1763_v20 }
 0x49e   : > { %v1766_v41 = vsel %vm1625_vm12, %v1764_v36, 0.0 }
 0x49f   : > { %1767 = vadd.xlane.f32.xlu1 %v1766_v41 }
 0x528   : > { %v1768_v6 = vpop.xlane.xlu1 %1767 }
 0x529   : > { %2464 = vrcp.f32 %v1768_v6 }
 0x536   : > { %v2465_v42 = vpop.eup %2464 }
 0x537   : > { %v1778_v43 = vrot.slane %v2465_v42, %v1636_v54  ;;  %v1782_v27 = vrot.slane %v2465_v42, %v1640_v12  ;;  %v1774_v62 = vrot.slane %v2465_v42, %v1632_v50  ;;  %v1786_v21 = vrot.slane %v2465_v42, %v1644_v55 }
 0x538   : > { %v1790_v47 = vrot.slane %v2465_v42, %v1648_v4  ;;  %v1794_v12 = vrot.slane %v2465_v42, %v1652_v61  ;;  %v1798_v50 = vrot.slane %v2465_v42, %v1656_v33  ;;  %v1802_v55 = vrot.slane %v2465_v42, %v1660_v19 }
 0x539   : > { %v1812_v35 = vmul.f32 %v2451_v10, %v1778_v43  ;;  %v1813_v63 = vmul.f32 %v2453_v44, %v1782_v27  ;;  %v1811_v40 = vmul.f32 %v2449_v29, %v1774_v62  ;;  %v1814_v48 = vmul.f32 %v2455_v53, %v1786_v21 }
 0x53a   : > { %v1815_v54 = vmul.f32 %v2457_v46, %v1790_v47  ;;  %v1816_v10 = vmul.f32 %v2459_v17, %v1794_v12  ;;  %v1817_v29 = vmul.f32 %v2461_v23, %v1798_v50  ;;  %v1818_v44 = vmul.f32 %v2463_v31, %v1802_v55  ;;  %v2223_v12 = vld [vmem:[%s530_s30] ss:$0 sm:$0xff]  ;;  %s1983_s30 = scalar_lea.sflag [#allocation3], %s489_s12 }
 0x53b   : > { %1826 = vperm.xlu0 %2423, %v1812_v35  }
 0x53f   : > { %1831 = vperm.xlu0 %2423, %v1813_v63  }
 0x543   : > { %1821 = vperm.xlu0 %2423, %v1811_v40  }
 0x547   : > { %1836 = vperm.xlu0 %2423, %v1814_v48  }
 0x54b   : > { %1841 = vperm.xlu0 %2423, %v1815_v54  }
 0x54f   : > { %1846 = vperm.xlu0 %2423, %v1816_v10  }
 0x553   : > { %1851 = vperm.xlu0 %2423, %v1817_v29  }
 0x557   : > { %1856 = vperm.xlu0 %2423, %v1818_v44  }
 0x5b6   : > { %v1827_v53 = vpop.permute.xlu0 %1826 }
 0x5b7   : > { %v1860_v4 = vmul.f32 %v1827_v53, %v1399_v56 }
 0x5b9   : > { %v1874_v17 = vsel %vm1110_vm1, %v1860_v4, 0.0 }
 0x5ba   : > { %v1832_v46 = vpop.permute.xlu0 %1831  ;;  %v1875_v23 = vrot.slane %v1874_v17, 4 }
 0x5bb   : > { %v1861_v61 = vmul.f32 %v1832_v46, %v1400_v60 }
 0x5bc   : > { %v1876_v56 = vadd.f32 %v1875_v23, %v1874_v17 }
 0x5bd   : > { %v1881_v1 = vsel %vm1110_vm1, %v1861_v61, 0.0 }
 0x5be   : > { %v1822_v58 = vpop.permute.xlu0 %1821  ;;  %v1882_v25 = vrot.slane %v1881_v1, 4 }
 0x5bf   : > { %v1859_v33 = vmul.f32 %v1822_v58, %v1398_v45  ;;  %v1877_v45 = vrot.slane %v1876_v56, 2 }
 0x5c0   : > { %v1883_v59 = vadd.f32 %v1882_v25, %v1881_v1 }
 0x5c1   : > { %v1867_v19 = vsel %vm1110_vm1, %v1859_v33, 0.0  ;;  %v1878_v32 = vadd.f32 %v1877_v45, %v1876_v56 }
 0x5c2   : > { %v1868_v31 = vrot.slane %v1867_v19, 4  ;;  %v1837_v7 = vpop.permute.xlu0 %1836  ;;  %v1884_v39 = vrot.slane %v1883_v59, 2 }
 0x5c3   : > { %v1862_v49 = vmul.f32 %v1837_v7, %v1401_v51  ;;  %v1879_v42 = vrot.slane %v1878_v32, 1 }
 0x5c4   : > { %v1869_v13 = vadd.f32 %v1868_v31, %v1867_v19  ;;  %v1885_v41 = vadd.f32 %v1884_v39, %v1883_v59 }
 0x5c5   : > { %v1888_v60 = vsel %vm1110_vm1, %v1862_v49, 0.0 }
 0x5c6   : > { %v1889_v57 = vrot.slane %v1888_v60, 4  ;;  %v1842_v5 = vpop.permute.xlu0 %1841  ;;  %v1870_v14 = vrot.slane %v1869_v13, 2  ;;  %v1886_v21 = vrot.slane %v1885_v41, 1 }
 0x5c7   : > { %v1863_v38 = vmul.f32 %v1842_v5, %v1402_v2 }
 0x5c8   : > { %v1890_v9 = vadd.f32 %v1889_v57, %v1888_v60  ;;  %v1871_v34 = vadd.f32 %v1870_v14, %v1869_v13  ;;  %v1887_v4 = vadd.f32 %v1886_v21, %v1885_v41 }
 0x5c9   : > { %v1895_v16 = vsel %vm1110_vm1, %v1863_v38, 0.0 }
 0x5ca   : > { %v1891_v52 = vrot.slane %v1890_v9, 2  ;;  %v1896_v8 = vrot.slane %v1895_v16, 4  ;;  %v1847_v24 = vpop.permute.xlu0 %1846  ;;  %v1872_v27 = vrot.slane %v1871_v34, 1  ;;  %v1932_v19 = vmul.f32 %v2223_v12, %v1887_v4 }
 0x5cb   : > { %v1864_v51 = vmul.f32 %v1847_v24, %v1403_v26 }
 0x5cc   : > { %v1897_v0 = vadd.f32 %v1896_v8, %v1895_v16  ;;  %v1892_v3 = vadd.f32 %v1891_v52, %v1890_v9  ;;  %v1873_v10 = vadd.f32 %v1872_v27, %v1871_v34  ;;  %v1948_v59 = vrot.slane %v1932_v19, 6 }
 0x5cd   : > { %v1902_v18 = vsel %vm1110_vm1, %v1864_v51, 0.0 }
 0x5ce   : > { %v1898_v2 = vrot.slane %v1897_v0, 2  ;;  %v1903_v20 = vrot.slane %v1902_v18, 4  ;;  %v1852_v36 = vpop.permute.xlu0 %1851  ;;  %v1893_v26 = vrot.slane %v1892_v3, 1  ;;  %v1930_v23 = vmul.f32 %v2223_v12, %v1873_v10 }
 0x5cf   : > { %v1865_v6 = vmul.f32 %v1852_v36, %v1404_v37  ;;  %v1880_v37 = vadd.f32 %v1879_v42, %v1878_v32 }
 0x5d0   : > { %v1899_v43 = vadd.f32 %v1898_v2, %v1897_v0  ;;  %v1904_v35 = vadd.f32 %v1903_v20, %v1902_v18  ;;  %v1894_v29 = vadd.f32 %v1893_v26, %v1892_v3  ;;  %v1966_v18 = vstv %s1965_s11  ;;  %s2569_s11 = smov [#allocation5]  }
 0x5d1   : > { %v1909_v28 = vsel %vm1110_vm1, %v1865_v6, 0.0  ;;  %v1931_v61 = vmul.f32 %v2223_v12, %v1880_v37  ;;  %s2489_s16 = sshll.u32 %s2569_s11, 4  ;;  %s2490_s16 = int_to_ptr.vmem [resolvable:$false] %s2489_s16 }
 0x5d2   : > { %v1905_v63 = vrot.slane %v1904_v35, 2  ;;  %v1910_v62 = vrot.slane %v1909_v28, 4  ;;  %v1857_v40 = vpop.permute.xlu0 %1856  ;;  %v1900_v48 = vrot.slane %v1899_v43, 1  ;;  %v1933_v11 = vmul.f32 %v2223_v12, %v1894_v29  ;;  %s2491_s0 = scalar_lea.vmem %s2490_s16, 32  ;;  %p2492_p0 = scmp.lt.s32.totalorder %s1997_s27, %s2490_s16 }
 0x5d3   : > { %v1866_v15 = vmul.f32 %v1857_v40, %v1405_v22  ;;  %v1946_v7 = vrot.slane %v1931_v61, 7  ;;  %p2493_p1 = scmp.lt.s32.totalorder %s2491_s0, %s2485_s20 }
 0x5d4   : > { %v1906_v47 = vadd.f32 %v1905_v63, %v1904_v35  ;;  %v1911_v54 = vadd.f32 %v1910_v62, %v1909_v28  ;;  %v1901_v46 = vadd.f32 %v1900_v48, %v1899_v43  ;;  %v1950_v60 = vrot.slane %v1933_v11, 5 }
 0x5d5   : > { %v1916_v50 = vsel %vm1110_vm1, %v1866_v15, 0.0  ;;  %v1947_v13 = vsel %vm1610_vm9, %v1946_v7, %v1930_v23  ;;  %p2494_p2 = por %p2493_p1, %p2492_p0 }
 0x5d6   : > { %v1907_v55 = vrot.slane %v1906_v47, 1  ;;  %v1912_v44 = vrot.slane %v1911_v54, 2  ;;  %v1917_v53 = vrot.slane %v1916_v50, 4  ;;  %v1934_v31 = vmul.f32 %v2223_v12, %v1901_v46 }
 0x5d7   : > { %v1949_v14 = vsel %vm1612_vm8, %v1948_v59, %v1947_v13  ;;  %p2495_p3 = pnand %p2494_p2, %p2488_p13 }
 0x5d8   : > { %v1908_v17 = vadd.f32 %v1907_v55, %v1906_v47  ;;  %v1913_v58 = vadd.f32 %v1912_v44, %v1911_v54  ;;  %v1918_v33 = vadd.f32 %v1917_v53, %v1916_v50  ;;  %v1952_v38 = vrot.slane %v1934_v31, 4 }
 0x5d9   : > { %v1951_v8 = vsel %vm1614_vm5, %v1950_v60, %v1949_v14 }
 0x5da   : > { %v1914_v22 = vrot.slane %v1913_v58, 1  ;;  %v1919_v1 = vrot.slane %v1918_v33, 2  ;;  %v1935_v25 = vmul.f32 %v2223_v12, %v1908_v17  ;;  %v1953_v24 = vsel %vm1616_vm7, %v1952_v38, %v1951_v8 }
 0x5dc   : > { %v1915_v49 = vadd.f32 %v1914_v22, %v1913_v58  ;;  %v1920_v56 = vadd.f32 %v1919_v1, %v1918_v33  ;;  %v1954_v45 = vrot.slane %v1935_v25, 3 }
 0x5de   : > { %v1921_v57 = vrot.slane %v1920_v56, 1  ;;  %v1936_v5 = vmul.f32 %v2223_v12, %v1915_v49  ;;  %v1955_v39 = vsel %vm1618_vm4, %v1954_v45, %v1953_v24 }
 0x5e0   : > { %v1922_v9 = vadd.f32 %v1921_v57, %v1920_v56  ;;  %v1956_v16 = vrot.slane %v1936_v5, 2 }
 0x5e2   : > { %v1937_v52 = vmul.f32 %v2223_v12, %v1922_v9  ;;  %v1957_v32 = vsel %vm1620_vm6, %v1956_v16, %v1955_v39 }
 0x5e4   : > { %v1958_v51 = vrot.slane %v1937_v52, 1 }
 0x5e6   : > { %v1959_v0 = vsel %vm1622_vm10, %v1958_v51, %v1957_v32 }
 0x5e7   : > { %v1961_v34 = vsel %vm1110_vm1, %v1959_v0, 0.0 }
 0x5e8   : > { %1962 = vadd.xlane.f32.xlu1 %v1961_v34 }
 0x671   : > { %v1963_v3 = vpop.xlane.xlu1 %1962 }
 0x672   : > { %v1967_v2 = vadd.f32 %v1966_v18, %v1963_v3 }
 0x674   : > { %v2224_v20 = vmul.f32 -1.442695, %v1967_v2 }
 0x676   : > { %2466 = vpow2.f32 %v2224_v20 }
 0x683   : > { %v2467_v36 = vpop.eup %2466 }
 0x684   : > { %v1971_v41 = vadd.f32 1.0, %v2467_v36 }
 0x686   : > { %2468 = vrcp.f32 %v1971_v41 }
 0x693   : > { %v2469_v6 = vpop.eup %2468 }
 0x694   : > { %v1978_v42 = vrot.slane %v2469_v6, %v3159_v30 }
 0x696   : > { %1981 = vst.msk [vmem:[%s490_s22] sm:$0x1] %vm1980_vm13, %v1978_v42 }
 0x697   : > { %2498 = shalt.err (!%p2495_p3)
}
 0x698   : > { %s2499_s1 = scalar_lea.hbm %s1994_s29, 16  ;;  %s2503_s22 = scalar_lea.hbm %s3321_s10, 32 }
 0x699   : > { %p2500_p5 = scmp.ne.s32.totalorder %s1994_s29, %s2499_s1  ;;  %p2504_p9 = scmp.lt.s32.totalorder %s1994_s29, %s3321_s10 }
 0x69a   : > { %p2505_p12 = scmp.lt.s32.totalorder %s2503_s22, %s2499_s1 }
 0x69b   : > { %p2501_p6 = pnand %p2500_p5, %p2665_p4 }
 0x69c   : > { %p2506_p10 = por %p2505_p12, %p2504_p9 }
 0x69d   : > { %p2502_p7 = pneg %p2501_p6 }
 0x69f   : > { %p2507_p11 = pnand %p2506_p10, %p2502_p7 }
 0x6a1   : > { %2510 = shalt.err (!%p2507_p11)
}
 0x6a2   : > { %2359 = dma.vmem_to_hbm [thread:$0]  (%p2665_p4), %s1997_s27, 16, %s1994_s29, %s1983_s30  }
 0x6a3 PF: > { %p2371_p13 = scmp.ge.s32.totalorder %s2565_s18, 2  ;;  %s2008_s0 = sand.u32 1, %s2545_s13  }
 0x6a4   : > { %s2009_s20 = scalar_lea.sflag [#allocation3], %s2008_s0 }
 0x6a5   : > { %p2366_p0 = pnand %p2371_p13, %p2672_p8 }
 0x6a7   : > { %p2367_p1 = pneg %p2366_p0 }
 0x6a9   : > { %2540 = dma.done.wait (%p2367_p1), %s2009_s20, 16  }
 0x6aa   : > { %2542 = vsyncadd (%p2367_p1), %s2009_s20, 4294967280  ;;  %s24_s18 = sadd.s32 1, %s2565_s18   ;;  %s3387_s13 = smov %s2549_s14 }
 0x6ab   : > { %p21_p2 = scmp.ge.s32.totalorder %s24_s18, 4   ;;  %s3388_s14 = smov %s2553_s15 }
 0x6ac   : > { %s3389_s15 = smov %s2678_s26  ;;  %s3390_s16 = smov %s2561_s17 }
 0x6ad   : > { %s3391_s17 = smov %s3393_s21  ;;  %23 = sbr.rel (!%p21_p2) target bundleno = 8 (0x8), region = 128 }
 0x6b2   :  { %2013 = vsyncpa [#allocation3], 1 }
 0x6b3   :  { %2015 = vsyncpa [#allocation3 + $0x1], 1 }
 0x6b4   :  { %2016 = vsyncpa [#allocation4], 1 }
 0x6b5   :  { %2018 = vsyncpa [#allocation4 + $0x1], 1 }

</bundles_post_ra>
